<compile_context>
chip_gen: v5e
topology: v5e:2x2
jax: 0.10.0
libtpu: 0.0.40
codegen_flags: <defaults>
</compile_context>

<pallas_src>
import jax
import jax.numpy as jnp
from jax.experimental import pallas as pl
from jax.experimental.pallas import tpu as pltpu


# ----------------------------------------------------------------------------
# Network configuration (a concrete instance of the generic GenerateNet graph)
# ----------------------------------------------------------------------------
NET_CONFIG = {
    "conv_1": {"config": {"in_channels": 4, "out_channels": 8, "kernel_size": 3,
                          "padding": 1, "stride": 1},
               "inbound_nodes": ["input"]},
    "bn_1": {"config": {"input_size": 8}, "inbound_nodes": ["conv_1"]},
    "relu_1": {"config": {}, "inbound_nodes": ["bn_1"]},
    "conv_2": {"config": {"in_channels": 8, "out_channels": 8, "kernel_size": 3,
                          "padding": 1, "stride": 1},
               "inbound_nodes": ["relu_1"]},
    "bn_2": {"config": {"input_size": 8}, "inbound_nodes": ["conv_2"]},
    "add_1": {"config": {}, "inbound_nodes": ["relu_1", "bn_2"]},
    "relu_2": {"config": {}, "inbound_nodes": ["add_1"]},
    "lambda_1": {"config": {}, "inbound_nodes": ["relu_2"]},
    "concat_1": {"config": {}, "inbound_nodes": ["relu_2", "lambda_1"]},
    "max_1": {"config": {"kernel_size": 2, "stride": 2},
              "inbound_nodes": ["concat_1"]},
    "fc_1": {"config": {"input_size": 16 * 8 * 8, "output_size": 10},
             "inbound_nodes": ["max_1"]},
}

_H = 16     # feature-map height
_W = 16     # feature-map width
_C = 8      # channels after conv_1 / conv_2
_EPS = 1e-5

# The lane layout (lane = w*_C + c, 16 groups of 8 channels) is hard-coded below.
assert _W * _C == 128 and _W == 16 and _C == 8


def init_params(net_config, key):
    params = {}
    for name in net_config:
        cfg = net_config[name]["config"]
        if "conv" in name:
            key, k1, k2 = jax.random.split(key, 3)
            w = 0.1 * jax.random.normal(
                k1, (cfg["out_channels"], cfg["in_channels"],
                     cfg["kernel_size"], cfg["kernel_size"]), jnp.float32)
            b = 0.1 * jax.random.normal(k2, (cfg["out_channels"],), jnp.float32)
            params[name] = (w, b)
        elif "bn" in name:
            key, k1, k2 = jax.random.split(key, 3)
            gamma = 1.0 + 0.1 * jax.random.normal(k1, (cfg["input_size"],), jnp.float32)
            beta = 0.1 * jax.random.normal(k2, (cfg["input_size"],), jnp.float32)
            params[name] = (gamma, beta)
        elif "fc" in name:
            key, k1, k2 = jax.random.split(key, 3)
            w = 0.05 * jax.random.normal(
                k1, (cfg["output_size"], cfg["input_size"]), jnp.float32)
            b = 0.05 * jax.random.normal(k2, (cfg["output_size"],), jnp.float32)
            params[name] = (w, b)
    return params


def _tree_sum(parts):
    parts = list(parts)
    while len(parts) > 1:
        nxt = [parts[i] + parts[i + 1] for i in range(0, len(parts) - 1, 2)]
        if len(parts) % 2:
            nxt.append(parts[-1])
        parts = nxt
    return parts[0]


# ----------------------------------------------------------------------------
# Fused Pallas kernel (whole forward pass, whole batch, one invocation)
# ----------------------------------------------------------------------------
def _fused_kernel(x_ref, w1_ref, b1_ref, g1_ref, bb1_ref,
                  w2_ref, b2_ref, g2_ref, bb2_ref,
                  wfc_ref, bfc_ref, out_ref):
    f32 = jnp.float32
    bf16 = jnp.bfloat16
    n_img = out_ref.shape[0]          # batch size N
    nr = x_ref.shape[0]               # N * H rows, ordered r = h*N + n (h-major)

    def mm(a, b):
        # bf16 operands on the MXU, f32 accumulation.
        return jnp.dot(a.astype(bf16), b, preferred_element_type=f32)

    def conv3x3(x, band_ref, bias_row):
        # x: (NR, Win*Cin) f32 slab.  band_ref: (3, Win*Cin, Wout*Cout) bf16
        # banded taps (W-direction padding=1 is baked into the band).
        # H-direction padding=1: sublane rolls (+/-N rows == +/-1 in h) on the
        # XLU plus edge-row masks from a tiny iota (no shift matmuls).
        ridx = jax.lax.broadcasted_iota(jnp.int32, x.shape, 0)
        x_hm1 = jnp.where(ridx < n_img, 0.0,
                          pltpu.roll(x, n_img, axis=0))        # row h <- x[h-1]
        x_hp1 = jnp.where(ridx >= nr - n_img, 0.0,
                          pltpu.roll(x, nr - n_img, axis=0))    # row h <- x[h+1]
        return (mm(x, band_ref[1]) + mm(x_hm1, band_ref[0])
                + mm(x_hp1, band_ref[2]) + bias_row)

    def bn_scale_shift(a, gamma_row, beta_row):
        # Training-mode BatchNorm2d (batch mean / biased variance per channel).
        # Entire statistics path stays in f32 on the VPU/XLU (no MXU).
        s1 = jnp.sum(a, axis=0, keepdims=True)          # (1,128) per-(w,c) sums
        s2 = jnp.sum(a * a, axis=0, keepdims=True)
        # Per-channel totals: log2 lane-rotation reduction over the 16 w-groups
        # (lane = w*_C + c); result is broadcast to every lane of that channel.
        for sh in (_C, 2 * _C, 4 * _C, 8 * _C):         # 8, 16, 32, 64
            s1 = s1 + pltpu.roll(s1, sh, axis=1)
            s2 = s2 + pltpu.roll(s2, sh, axis=1)
        inv_m = 1.0 / (a.shape[0] * _W)                 # 1 / (N*H*W)
        mean = s1 * inv_m
        var = s2 * inv_m - mean * mean
        scale = gamma_row * jax.lax.rsqrt(var + _EPS)
        return scale, beta_row - mean * scale

    x = x_ref[...]                                      # (NR, W*Cin) f32

    # conv_1 (+bias) -> bn_1 -> relu_1
    a1 = conv3x3(x, w1_ref, b1_ref[...])                # (NR, 128) f32
    sc1, sh1 = bn_scale_shift(a1, g1_ref[...], bb1_ref[...])
    r1 = jnp.maximum(a1 * sc1 + sh1, 0.0)

    # conv_2 (+bias) -> bn_2 ; add_1 = relu_1 + bn_2 ; relu_2
    a2 = conv3x3(r1, w2_ref, b2_ref[...])
    sc2, sh2 = bn_scale_shift(a2, g2_ref[...], bb2_ref[...])
    r2 = jnp.maximum(r1 + (a2 * sc2 + sh2), 0.0)

    # max_1 (2x2 / stride 2): rows via sublane roll, lanes via lane roll.
    # Row h holds max(h, h+1); odd-h rows are garbage and never read.
    rmax = jnp.maximum(r2, pltpu.roll(r2, nr - n_img, axis=0))
    # Lane 2*_C*wo + c holds the full 2x2 max; other lanes are garbage that the
    # zero-padded fc weight nulls out.
    pooled = jnp.maximum(rmax, pltpu.roll(rmax, 128 - _C, axis=1))

    # fc_1 (lambda_1 + concat_1 already folded into wfc): hp batched matmuls
    # with M = N (contiguous slab slices thanks to h-major row order), tree-sum,
    # then one full (N, 128) store.
    hp = _H // 2
    parts = [mm(pooled[2 * ho * n_img:(2 * ho + 1) * n_img, :], wfc_ref[ho])
             for ho in range(hp)]
    out_ref[...] = _tree_sum(parts) + bfc_ref[...]


# ----------------------------------------------------------------------------
# Wrapper: weight preprocessing (pure, tiny) + single pallas_call
# ----------------------------------------------------------------------------
def _make_band(w_oihw, width):
    """Per-kh banded weights so that out_row(h) += in_row(h+kh-1) @ band[kh].

    band[kh][w_in*Cin + ci, w_out*Cout + co] = w[co, ci, kh, w_in - w_out + 1]
    (zero outside the 3-tap window) -> W-direction padding=1 is baked in.
    """
    cout, cin, k, _ = w_oihw.shape
    wt = jnp.transpose(w_oihw, (2, 3, 1, 0))                  # (kh, kw, Cin, Cout)
    w_in = jnp.arange(width)[:, None]
    w_out = jnp.arange(width)[None, :]
    kw = w_in - w_out + 1
    valid = ((kw >= 0) & (kw < k)).astype(w_oihw.dtype)
    taps = wt[:, jnp.clip(kw, 0, k - 1)]                      # (kh, w_in, w_out, Cin, Cout)
    taps = taps * valid[None, :, :, None, None]
    taps = jnp.transpose(taps, (0, 1, 3, 2, 4))               # (kh, w_in, Cin, w_out, Cout)
    return taps.reshape(k, width * cin, width * cout)


def _make_fc_weight(w_fc, n_pool_ch=_C, hp=_H // 2, wp=_W // 2):
    """Fold lambda_1 (0.5x) + concat_1 into the fc weight and lay it out as
    (hp, 128, 128): [pooled row ho, lane 16*wo + c, zero-padded output unit]."""
    nout = w_fc.shape[0]
    wr = w_fc.reshape(nout, 2 * n_pool_ch, hp, wp)            # torch (c, h, w) flatten order
    w_eff = wr[:, :n_pool_ch] + 0.5 * wr[:, n_pool_ch:]       # maxpool commutes with 0.5x
    t = jnp.transpose(w_eff, (2, 3, 1, 0))                    # (hp, wp, C, nout)
    t = jnp.pad(t, ((0, 0), (0, 0), (0, 2 * n_pool_ch - n_pool_ch), (0, 0)))
    t = t.reshape(hp, wp * 2 * n_pool_ch, nout)               # lane = 16*wo + c
    return jnp.pad(t, ((0, 0), (0, 128 - wp * 2 * n_pool_ch), (0, 128 - nout)))


def _full_spec(shape):
    return pl.BlockSpec(shape, lambda: (0,) * len(shape))


def generate_net_forward(x_nchw, params):
    """Fused Pallas forward for the NET_CONFIG graph. Same semantics as the
    PyTorch GenerateNet on that graph with fresh BatchNorm layers in training
    mode (batch statistics). Accepts the PyTorch NCHW input layout."""
    n, cin, h, w = x_nchw.shape
    assert (h, w) == (_H, _W)
    assert cin == NET_CONFIG["conv_1"]["config"]["in_channels"]

    w1, b1 = params["conv_1"]
    g1, bb1 = params["bn_1"]
    w2, b2 = params["conv_2"]
    g2, bb2 = params["bn_2"]
    wfc, bfc = params["fc_1"]
    nout = wfc.shape[0]

    # Layout / weight preprocessing (tiny, done once per call, fused by XLA).
    # Activation slab is h-major / n-minor: row r = h*N + n, lane = w*C + c.
    x2d = jnp.transpose(x_nchw, (2, 0, 3, 1)).reshape(h * n, w * cin).astype(jnp.float32)
    tile_c = lambda v: jnp.tile(v, _W).reshape(1, _W * v.shape[0]).astype(jnp.float32)
    to_bf16 = lambda a: a.astype(jnp.bfloat16)
    inputs = (
        x2d,                                       # (N*H, W*Cin) f32
        to_bf16(_make_band(w1, _W)),               # (3,  64, 128) bf16
        tile_c(b1), tile_c(g1), tile_c(bb1),       # (1, 128) f32 each
        to_bf16(_make_band(w2, _W)),               # (3, 128, 128) bf16
        tile_c(b2), tile_c(g2), tile_c(bb2),
        to_bf16(_make_fc_weight(wfc)),             # (8, 128, 128) bf16
        jnp.zeros((1, 128), jnp.float32).at[0, :nout].set(bfc),
    )

    out = pl.pallas_call(
        _fused_kernel,
        out_shape=jax.ShapeDtypeStruct((n, 128), jnp.float32),
        in_specs=[_full_spec(a.shape) for a in inputs],
        out_specs=_full_spec((n, 128)),
        compiler_params=pltpu.CompilerParams(vmem_limit_bytes=4 * 1024 * 1024),
    )(*inputs)
    return out[:, :nout]


# ----------------------------------------------------------------------------
# Pure-JAX reference: generic graph interpreter mirroring GenerateNet.forward
# ----------------------------------------------------------------------------
def reference_forward(x_nchw, params, net_config=NET_CONFIG):
    node_list = [[name] + list(net_config[name]["inbound_nodes"]) for name in net_config]
    layer_out = {"input": x_nchw}
    final_node = None
    while node_list:
        prev_len = len(node_list)
        for node in list(node_list):
            name, inbound = node[0], node[1:]
            if not set(inbound) <= set(layer_out.keys()):
                continue
            cfg = net_config[name]["config"]
            if "add" in name:
                y = layer_out[inbound[0]] + layer_out[inbound[1]]
            elif "concat" in name:
                y = jnp.concatenate([layer_out[inbound[0]], layer_out[inbound[1]]], axis=1)
            elif "fc" in name:
                wf, bf = params[name]
                flat = layer_out[inbound[0]].reshape(layer_out[inbound[0]].shape[0], -1)
                y = jnp.dot(flat, wf.T, precision=jax.lax.Precision.HIGHEST) + bf
            elif "lambda" in name:
                y = 0.5 * layer_out[inbound[0]]
            elif "conv" in name:
                wc, bc = params[name]
                y = jax.lax.conv_general_dilated(
                    layer_out[inbound[0]], wc, (1, 1),
                    [(cfg["padding"], cfg["padding"])] * 2,
                    dimension_numbers=("NCHW", "OIHW", "NCHW"),
                    precision=jax.lax.Precision.HIGHEST) + bc.reshape(1, -1, 1, 1)
            elif "bn" in name:
                g, bb = params[name]
                xx = layer_out[inbound[0]]
                mean = jnp.mean(xx, axis=(0, 2, 3), keepdims=True)
                var = jnp.mean((xx - mean) ** 2, axis=(0, 2, 3), keepdims=True)
                y = ((xx - mean) * jax.lax.rsqrt(var + _EPS)
                     * g.reshape(1, -1, 1, 1) + bb.reshape(1, -1, 1, 1))
            elif "relu" in name:
                y = jnp.maximum(layer_out[inbound[0]], 0.0)
            elif "max" in name:
                xx = layer_out[inbound[0]]
                nn_, cc_, hh_, ww_ = xx.shape
                s = cfg["stride"]
                y = jnp.max(xx.reshape(nn_, cc_, hh_ // s, s, ww_ // s, s), axis=(3, 5))
            else:
                raise ValueError(f"unknown node type: {name}")
            layer_out[name] = y
            final_node = name
            node_list.remove(node)
        assert len(node_list) < prev_len, "Net configuration error!"
    return layer_out[final_node]


if __name__ == "__main__":
    key = jax.random.PRNGKey(0)
    kx, kp = jax.random.split(key)
    x = jax.random.normal(kx, (2, 4, 16, 16), jnp.float32)   # NCHW, like PyTorch
    params = init_params(NET_CONFIG, kp)

    fused = jax.jit(generate_net_forward)
    out = jax.block_until_ready(fused(x, params))
    assert out.shape == (2, 10), out.shape
    assert bool(jnp.all(jnp.isfinite(out)))

    # Correctness check against the pure-JAX graph interpreter. Tolerance
    # accommodates bf16 MXU operands vs. the Precision.HIGHEST f32 reference.
    ref = reference_forward(x, params)
    max_err = float(jnp.max(jnp.abs(out - ref)))
    assert max_err < 1e-1, f"fused kernel mismatch vs reference: {max_err}"

    print("KERNEL_OK")
</pallas_src>

<mosaic_0001>
module attributes {stable_mosaic.version = 11 : i64} {
  func.func @_fused_kernel(%arg0: memref<32x64xf32, #tpu.memory_space<vmem>>, %arg1: memref<3x64x128xbf16, #tpu.memory_space<vmem>>, %arg2: memref<1x128xf32, #tpu.memory_space<vmem>>, %arg3: memref<1x128xf32, #tpu.memory_space<vmem>>, %arg4: memref<1x128xf32, #tpu.memory_space<vmem>>, %arg5: memref<3x128x128xbf16, #tpu.memory_space<vmem>>, %arg6: memref<1x128xf32, #tpu.memory_space<vmem>>, %arg7: memref<1x128xf32, #tpu.memory_space<vmem>>, %arg8: memref<1x128xf32, #tpu.memory_space<vmem>>, %arg9: memref<8x128x128xbf16, #tpu.memory_space<vmem>>, %arg10: memref<1x128xf32, #tpu.memory_space<vmem>>, %arg11: memref<2x128xf32, #tpu.memory_space<vmem>>) attributes {dimension_semantics = [], scalar_prefetch = 0 : i64, scratch_operands = 0 : i64, tpu.core_type = #tpu.core_type<tc>} {
    %c0 = arith.constant 0 : index
    %c0_0 = arith.constant 0 : index
    %0 = vector.load %arg0[%c0, %c0_0] : memref<32x64xf32, #tpu.memory_space<vmem>>, vector<32x64xf32>
    %c0_1 = arith.constant 0 : index
    %c0_2 = arith.constant 0 : index
    %1 = vector.load %arg2[%c0_1, %c0_2] : memref<1x128xf32, #tpu.memory_space<vmem>>, vector<1x128xf32>
    %2 = tpu.iota {dimensions = array<i32: 0>} : vector<32x64xi32>
    %c2_i32 = arith.constant 2 : i32
    %3 = vector.broadcast %c2_i32 : i32 to vector<32x64xi32>
    %4 = arith.cmpi slt, %2, %3 : vector<32x64xi32>
    %c2_i32_3 = arith.constant 2 : i32
    %5 = tpu.dynamic_rotate %0 by %c2_i32_3 dim 0 : vector<32x64xf32>, i32 -> vector<32x64xf32>
    %cst = arith.constant 0.000000e+00 : f32
    %6 = vector.broadcast %cst : f32 to vector<32x64xf32>
    %7 = arith.select %4, %6, %5 : vector<32x64xi1>, vector<32x64xf32>
    %c30_i32 = arith.constant 30 : i32
    %8 = vector.broadcast %c30_i32 : i32 to vector<32x64xi32>
    %9 = arith.cmpi sge, %2, %8 : vector<32x64xi32>
    %c30_i32_4 = arith.constant 30 : i32
    %10 = tpu.dynamic_rotate %0 by %c30_i32_4 dim 0 : vector<32x64xf32>, i32 -> vector<32x64xf32>
    %cst_5 = arith.constant 0.000000e+00 : f32
    %11 = vector.broadcast %cst_5 : f32 to vector<32x64xf32>
    %12 = arith.select %9, %11, %10 : vector<32x64xi1>, vector<32x64xf32>
    %c1 = arith.constant 1 : index
    %c0_6 = arith.constant 0 : index
    %c0_7 = arith.constant 0 : index
    %13 = vector.load %arg1[%c1, %c0_6, %c0_7] : memref<3x64x128xbf16, #tpu.memory_space<vmem>>, vector<1x64x128xbf16>
    %14 = vector.shape_cast %13 : vector<1x64x128xbf16> to vector<64x128xbf16>
    %15 = arith.truncf %0 : vector<32x64xf32> to vector<32x64xbf16>
    %cst_8 = arith.constant dense<0.000000e+00> : vector<32x128xf32>
    %16 = tpu.matmul %15, %14, %cst_8 {dimension_numbers = #tpu.dot_dimension_numbers<[1], [0], [0], [1], [0, 0, 1, 1], [], []>} : vector<32x64xbf16>, vector<64x128xbf16>, vector<32x128xf32> -> vector<32x128xf32>
    %c0_9 = arith.constant 0 : index
    %c0_10 = arith.constant 0 : index
    %c0_11 = arith.constant 0 : index
    %17 = vector.load %arg1[%c0_9, %c0_10, %c0_11] : memref<3x64x128xbf16, #tpu.memory_space<vmem>>, vector<1x64x128xbf16>
    %18 = vector.shape_cast %17 : vector<1x64x128xbf16> to vector<64x128xbf16>
    %19 = arith.truncf %7 : vector<32x64xf32> to vector<32x64xbf16>
    %cst_12 = arith.constant dense<0.000000e+00> : vector<32x128xf32>
    %20 = tpu.matmul %19, %18, %cst_12 {dimension_numbers = #tpu.dot_dimension_numbers<[1], [0], [0], [1], [0, 0, 1, 1], [], []>} : vector<32x64xbf16>, vector<64x128xbf16>, vector<32x128xf32> -> vector<32x128xf32>
    %21 = arith.addf %16, %20 : vector<32x128xf32>
    %c2 = arith.constant 2 : index
    %c0_13 = arith.constant 0 : index
    %c0_14 = arith.constant 0 : index
    %22 = vector.load %arg1[%c2, %c0_13, %c0_14] : memref<3x64x128xbf16, #tpu.memory_space<vmem>>, vector<1x64x128xbf16>
    %23 = vector.shape_cast %22 : vector<1x64x128xbf16> to vector<64x128xbf16>
    %24 = arith.truncf %12 : vector<32x64xf32> to vector<32x64xbf16>
    %cst_15 = arith.constant dense<0.000000e+00> : vector<32x128xf32>
    %25 = tpu.matmul %24, %23, %cst_15 {dimension_numbers = #tpu.dot_dimension_numbers<[1], [0], [0], [1], [0, 0, 1, 1], [], []>} : vector<32x64xbf16>, vector<64x128xbf16>, vector<32x128xf32> -> vector<32x128xf32>
    %26 = arith.addf %21, %25 : vector<32x128xf32>
    %27 = vector.broadcast %1 : vector<1x128xf32> to vector<32x128xf32>
    %28 = arith.addf %26, %27 : vector<32x128xf32>
    %c0_16 = arith.constant 0 : index
    %c0_17 = arith.constant 0 : index
    %29 = vector.load %arg3[%c0_16, %c0_17] : memref<1x128xf32, #tpu.memory_space<vmem>>, vector<1x128xf32>
    %c0_18 = arith.constant 0 : index
    %c0_19 = arith.constant 0 : index
    %30 = vector.load %arg4[%c0_18, %c0_19] : memref<1x128xf32, #tpu.memory_space<vmem>>, vector<1x128xf32>
    %cst_20 = arith.constant dense<0.000000e+00> : vector<128xf32>
    %31 = vector.multi_reduction <add>, %28, %cst_20 [0] : vector<32x128xf32> to vector<128xf32>
    %32 = vector.shape_cast %31 : vector<128xf32> to vector<1x128xf32>
    %33 = arith.mulf %28, %28 : vector<32x128xf32>
    %cst_21 = arith.constant dense<0.000000e+00> : vector<128xf32>
    %34 = vector.multi_reduction <add>, %33, %cst_21 [0] : vector<32x128xf32> to vector<128xf32>
    %35 = vector.shape_cast %34 : vector<128xf32> to vector<1x128xf32>
    %c8_i32 = arith.constant 8 : i32
    %36 = tpu.dynamic_rotate %32 by %c8_i32 dim 1 : vector<1x128xf32>, i32 -> vector<1x128xf32>
    %37 = arith.addf %32, %36 : vector<1x128xf32>
    %c8_i32_22 = arith.constant 8 : i32
    %38 = tpu.dynamic_rotate %35 by %c8_i32_22 dim 1 : vector<1x128xf32>, i32 -> vector<1x128xf32>
    %39 = arith.addf %35, %38 : vector<1x128xf32>
    %c16_i32 = arith.constant 16 : i32
    %40 = tpu.dynamic_rotate %37 by %c16_i32 dim 1 : vector<1x128xf32>, i32 -> vector<1x128xf32>
    %41 = arith.addf %37, %40 : vector<1x128xf32>
    %c16_i32_23 = arith.constant 16 : i32
    %42 = tpu.dynamic_rotate %39 by %c16_i32_23 dim 1 : vector<1x128xf32>, i32 -> vector<1x128xf32>
    %43 = arith.addf %39, %42 : vector<1x128xf32>
    %c32_i32 = arith.constant 32 : i32
    %44 = tpu.dynamic_rotate %41 by %c32_i32 dim 1 : vector<1x128xf32>, i32 -> vector<1x128xf32>
    %45 = arith.addf %41, %44 : vector<1x128xf32>
    %c32_i32_24 = arith.constant 32 : i32
    %46 = tpu.dynamic_rotate %43 by %c32_i32_24 dim 1 : vector<1x128xf32>, i32 -> vector<1x128xf32>
    %47 = arith.addf %43, %46 : vector<1x128xf32>
    %c64_i32 = arith.constant 64 : i32
    %48 = tpu.dynamic_rotate %45 by %c64_i32 dim 1 : vector<1x128xf32>, i32 -> vector<1x128xf32>
    %49 = arith.addf %45, %48 : vector<1x128xf32>
    %c64_i32_25 = arith.constant 64 : i32
    %50 = tpu.dynamic_rotate %47 by %c64_i32_25 dim 1 : vector<1x128xf32>, i32 -> vector<1x128xf32>
    %51 = arith.addf %47, %50 : vector<1x128xf32>
    %cst_26 = arith.constant 0.001953125 : f32
    %52 = vector.broadcast %cst_26 : f32 to vector<1x128xf32>
    %53 = arith.mulf %49, %52 : vector<1x128xf32>
    %cst_27 = arith.constant 0.001953125 : f32
    %54 = vector.broadcast %cst_27 : f32 to vector<1x128xf32>
    %55 = arith.mulf %51, %54 : vector<1x128xf32>
    %56 = arith.mulf %53, %53 : vector<1x128xf32>
    %57 = arith.subf %55, %56 : vector<1x128xf32>
    %cst_28 = arith.constant 9.99999974E-6 : f32
    %58 = vector.broadcast %cst_28 : f32 to vector<1x128xf32>
    %59 = arith.addf %57, %58 : vector<1x128xf32>
    %60 = math.rsqrt %59 : vector<1x128xf32>
    %61 = arith.mulf %29, %60 : vector<1x128xf32>
    %62 = arith.mulf %53, %61 : vector<1x128xf32>
    %63 = arith.subf %30, %62 : vector<1x128xf32>
    %64 = vector.broadcast %61 : vector<1x128xf32> to vector<32x128xf32>
    %65 = arith.mulf %28, %64 : vector<32x128xf32>
    %66 = vector.broadcast %63 : vector<1x128xf32> to vector<32x128xf32>
    %67 = arith.addf %65, %66 : vector<32x128xf32>
    %cst_29 = arith.constant 0.000000e+00 : f32
    %68 = vector.broadcast %cst_29 : f32 to vector<32x128xf32>
    %69 = arith.maximumf %67, %68 : vector<32x128xf32>
    %c0_30 = arith.constant 0 : index
    %c0_31 = arith.constant 0 : index
    %70 = vector.load %arg6[%c0_30, %c0_31] : memref<1x128xf32, #tpu.memory_space<vmem>>, vector<1x128xf32>
    %71 = tpu.iota {dimensions = array<i32: 0>} : vector<32x128xi32>
    %c2_i32_32 = arith.constant 2 : i32
    %72 = vector.broadcast %c2_i32_32 : i32 to vector<32x128xi32>
    %73 = arith.cmpi slt, %71, %72 : vector<32x128xi32>
    %c2_i32_33 = arith.constant 2 : i32
    %74 = tpu.dynamic_rotate %69 by %c2_i32_33 dim 0 : vector<32x128xf32>, i32 -> vector<32x128xf32>
    %cst_34 = arith.constant 0.000000e+00 : f32
    %75 = vector.broadcast %cst_34 : f32 to vector<32x128xf32>
    %76 = arith.select %73, %75, %74 : vector<32x128xi1>, vector<32x128xf32>
    %c30_i32_35 = arith.constant 30 : i32
    %77 = vector.broadcast %c30_i32_35 : i32 to vector<32x128xi32>
    %78 = arith.cmpi sge, %71, %77 : vector<32x128xi32>
    %c30_i32_36 = arith.constant 30 : i32
    %79 = tpu.dynamic_rotate %69 by %c30_i32_36 dim 0 : vector<32x128xf32>, i32 -> vector<32x128xf32>
    %cst_37 = arith.constant 0.000000e+00 : f32
    %80 = vector.broadcast %cst_37 : f32 to vector<32x128xf32>
    %81 = arith.select %78, %80, %79 : vector<32x128xi1>, vector<32x128xf32>
    %c1_38 = arith.constant 1 : index
    %c0_39 = arith.constant 0 : index
    %c0_40 = arith.constant 0 : index
    %82 = vector.load %arg5[%c1_38, %c0_39, %c0_40] : memref<3x128x128xbf16, #tpu.memory_space<vmem>>, vector<1x128x128xbf16>
    %83 = vector.shape_cast %82 : vector<1x128x128xbf16> to vector<128x128xbf16>
    %84 = arith.truncf %69 : vector<32x128xf32> to vector<32x128xbf16>
    %cst_41 = arith.constant dense<0.000000e+00> : vector<32x128xf32>
    %85 = tpu.matmul %84, %83, %cst_41 {dimension_numbers = #tpu.dot_dimension_numbers<[1], [0], [0], [1], [0, 0, 1, 1], [], []>} : vector<32x128xbf16>, vector<128x128xbf16>, vector<32x128xf32> -> vector<32x128xf32>
    %c0_42 = arith.constant 0 : index
    %c0_43 = arith.constant 0 : index
    %c0_44 = arith.constant 0 : index
    %86 = vector.load %arg5[%c0_42, %c0_43, %c0_44] : memref<3x128x128xbf16, #tpu.memory_space<vmem>>, vector<1x128x128xbf16>
    %87 = vector.shape_cast %86 : vector<1x128x128xbf16> to vector<128x128xbf16>
    %88 = arith.truncf %76 : vector<32x128xf32> to vector<32x128xbf16>
    %cst_45 = arith.constant dense<0.000000e+00> : vector<32x128xf32>
    %89 = tpu.matmul %88, %87, %cst_45 {dimension_numbers = #tpu.dot_dimension_numbers<[1], [0], [0], [1], [0, 0, 1, 1], [], []>} : vector<32x128xbf16>, vector<128x128xbf16>, vector<32x128xf32> -> vector<32x128xf32>
    %90 = arith.addf %85, %89 : vector<32x128xf32>
    %c2_46 = arith.constant 2 : index
    %c0_47 = arith.constant 0 : index
    %c0_48 = arith.constant 0 : index
    %91 = vector.load %arg5[%c2_46, %c0_47, %c0_48] : memref<3x128x128xbf16, #tpu.memory_space<vmem>>, vector<1x128x128xbf16>
    %92 = vector.shape_cast %91 : vector<1x128x128xbf16> to vector<128x128xbf16>
    %93 = arith.truncf %81 : vector<32x128xf32> to vector<32x128xbf16>
    %cst_49 = arith.constant dense<0.000000e+00> : vector<32x128xf32>
    %94 = tpu.matmul %93, %92, %cst_49 {dimension_numbers = #tpu.dot_dimension_numbers<[1], [0], [0], [1], [0, 0, 1, 1], [], []>} : vector<32x128xbf16>, vector<128x128xbf16>, vector<32x128xf32> -> vector<32x128xf32>
    %95 = arith.addf %90, %94 : vector<32x128xf32>
    %96 = vector.broadcast %70 : vector<1x128xf32> to vector<32x128xf32>
    %97 = arith.addf %95, %96 : vector<32x128xf32>
    %c0_50 = arith.constant 0 : index
    %c0_51 = arith.constant 0 : index
    %98 = vector.load %arg7[%c0_50, %c0_51] : memref<1x128xf32, #tpu.memory_space<vmem>>, vector<1x128xf32>
    %c0_52 = arith.constant 0 : index
    %c0_53 = arith.constant 0 : index
    %99 = vector.load %arg8[%c0_52, %c0_53] : memref<1x128xf32, #tpu.memory_space<vmem>>, vector<1x128xf32>
    %cst_54 = arith.constant dense<0.000000e+00> : vector<128xf32>
    %100 = vector.multi_reduction <add>, %97, %cst_54 [0] : vector<32x128xf32> to vector<128xf32>
    %101 = vector.shape_cast %100 : vector<128xf32> to vector<1x128xf32>
    %102 = arith.mulf %97, %97 : vector<32x128xf32>
    %cst_55 = arith.constant dense<0.000000e+00> : vector<128xf32>
    %103 = vector.multi_reduction <add>, %102, %cst_55 [0] : vector<32x128xf32> to vector<128xf32>
    %104 = vector.shape_cast %103 : vector<128xf32> to vector<1x128xf32>
    %c8_i32_56 = arith.constant 8 : i32
    %105 = tpu.dynamic_rotate %101 by %c8_i32_56 dim 1 : vector<1x128xf32>, i32 -> vector<1x128xf32>
    %106 = arith.addf %101, %105 : vector<1x128xf32>
    %c8_i32_57 = arith.constant 8 : i32
    %107 = tpu.dynamic_rotate %104 by %c8_i32_57 dim 1 : vector<1x128xf32>, i32 -> vector<1x128xf32>
    %108 = arith.addf %104, %107 : vector<1x128xf32>
    %c16_i32_58 = arith.constant 16 : i32
    %109 = tpu.dynamic_rotate %106 by %c16_i32_58 dim 1 : vector<1x128xf32>, i32 -> vector<1x128xf32>
    %110 = arith.addf %106, %109 : vector<1x128xf32>
    %c16_i32_59 = arith.constant 16 : i32
    %111 = tpu.dynamic_rotate %108 by %c16_i32_59 dim 1 : vector<1x128xf32>, i32 -> vector<1x128xf32>
    %112 = arith.addf %108, %111 : vector<1x128xf32>
    %c32_i32_60 = arith.constant 32 : i32
    %113 = tpu.dynamic_rotate %110 by %c32_i32_60 dim 1 : vector<1x128xf32>, i32 -> vector<1x128xf32>
    %114 = arith.addf %110, %113 : vector<1x128xf32>
    %c32_i32_61 = arith.constant 32 : i32
    %115 = tpu.dynamic_rotate %112 by %c32_i32_61 dim 1 : vector<1x128xf32>, i32 -> vector<1x128xf32>
    %116 = arith.addf %112, %115 : vector<1x128xf32>
    %c64_i32_62 = arith.constant 64 : i32
    %117 = tpu.dynamic_rotate %114 by %c64_i32_62 dim 1 : vector<1x128xf32>, i32 -> vector<1x128xf32>
    %118 = arith.addf %114, %117 : vector<1x128xf32>
    %c64_i32_63 = arith.constant 64 : i32
    %119 = tpu.dynamic_rotate %116 by %c64_i32_63 dim 1 : vector<1x128xf32>, i32 -> vector<1x128xf32>
    %120 = arith.addf %116, %119 : vector<1x128xf32>
    %cst_64 = arith.constant 0.001953125 : f32
    %121 = vector.broadcast %cst_64 : f32 to vector<1x128xf32>
    %122 = arith.mulf %118, %121 : vector<1x128xf32>
    %cst_65 = arith.constant 0.001953125 : f32
    %123 = vector.broadcast %cst_65 : f32 to vector<1x128xf32>
    %124 = arith.mulf %120, %123 : vector<1x128xf32>
    %125 = arith.mulf %122, %122 : vector<1x128xf32>
    %126 = arith.subf %124, %125 : vector<1x128xf32>
    %cst_66 = arith.constant 9.99999974E-6 : f32
    %127 = vector.broadcast %cst_66 : f32 to vector<1x128xf32>
    %128 = arith.addf %126, %127 : vector<1x128xf32>
    %129 = math.rsqrt %128 : vector<1x128xf32>
    %130 = arith.mulf %98, %129 : vector<1x128xf32>
    %131 = arith.mulf %122, %130 : vector<1x128xf32>
    %132 = arith.subf %99, %131 : vector<1x128xf32>
    %133 = vector.broadcast %130 : vector<1x128xf32> to vector<32x128xf32>
    %134 = arith.mulf %97, %133 : vector<32x128xf32>
    %135 = vector.broadcast %132 : vector<1x128xf32> to vector<32x128xf32>
    %136 = arith.addf %134, %135 : vector<32x128xf32>
    %137 = arith.addf %69, %136 : vector<32x128xf32>
    %cst_67 = arith.constant 0.000000e+00 : f32
    %138 = vector.broadcast %cst_67 : f32 to vector<32x128xf32>
    %139 = arith.maximumf %137, %138 : vector<32x128xf32>
    %c30_i32_68 = arith.constant 30 : i32
    %140 = tpu.dynamic_rotate %139 by %c30_i32_68 dim 0 : vector<32x128xf32>, i32 -> vector<32x128xf32>
    %141 = arith.maximumf %139, %140 : vector<32x128xf32>
    %c120_i32 = arith.constant 120 : i32
    %142 = tpu.dynamic_rotate %141 by %c120_i32 dim 1 : vector<32x128xf32>, i32 -> vector<32x128xf32>
    %143 = arith.maximumf %141, %142 : vector<32x128xf32>
    %144 = vector.extract_strided_slice %143 {offsets = [0, 0], sizes = [2, 128], strides = [1, 1]} : vector<32x128xf32> to vector<2x128xf32>
    %c0_69 = arith.constant 0 : index
    %c0_70 = arith.constant 0 : index
    %c0_71 = arith.constant 0 : index
    %145 = vector.load %arg9[%c0_69, %c0_70, %c0_71] : memref<8x128x128xbf16, #tpu.memory_space<vmem>>, vector<1x128x128xbf16>
    %146 = vector.shape_cast %145 : vector<1x128x128xbf16> to vector<128x128xbf16>
    %147 = arith.truncf %144 : vector<2x128xf32> to vector<2x128xbf16>
    %cst_72 = arith.constant dense<0.000000e+00> : vector<2x128xf32>
    %148 = tpu.matmul %147, %146, %cst_72 {dimension_numbers = #tpu.dot_dimension_numbers<[1], [0], [0], [1], [0, 0, 1, 1], [], []>} : vector<2x128xbf16>, vector<128x128xbf16>, vector<2x128xf32> -> vector<2x128xf32>
    %149 = vector.extract_strided_slice %143 {offsets = [4, 0], sizes = [2, 128], strides = [1, 1]} : vector<32x128xf32> to vector<2x128xf32>
    %c1_73 = arith.constant 1 : index
    %c0_74 = arith.constant 0 : index
    %c0_75 = arith.constant 0 : index
    %150 = vector.load %arg9[%c1_73, %c0_74, %c0_75] : memref<8x128x128xbf16, #tpu.memory_space<vmem>>, vector<1x128x128xbf16>
    %151 = vector.shape_cast %150 : vector<1x128x128xbf16> to vector<128x128xbf16>
    %152 = arith.truncf %149 : vector<2x128xf32> to vector<2x128xbf16>
    %cst_76 = arith.constant dense<0.000000e+00> : vector<2x128xf32>
    %153 = tpu.matmul %152, %151, %cst_76 {dimension_numbers = #tpu.dot_dimension_numbers<[1], [0], [0], [1], [0, 0, 1, 1], [], []>} : vector<2x128xbf16>, vector<128x128xbf16>, vector<2x128xf32> -> vector<2x128xf32>
    %154 = vector.extract_strided_slice %143 {offsets = [8, 0], sizes = [2, 128], strides = [1, 1]} : vector<32x128xf32> to vector<2x128xf32>
    %c2_77 = arith.constant 2 : index
    %c0_78 = arith.constant 0 : index
    %c0_79 = arith.constant 0 : index
    %155 = vector.load %arg9[%c2_77, %c0_78, %c0_79] : memref<8x128x128xbf16, #tpu.memory_space<vmem>>, vector<1x128x128xbf16>
    %156 = vector.shape_cast %155 : vector<1x128x128xbf16> to vector<128x128xbf16>
    %157 = arith.truncf %154 : vector<2x128xf32> to vector<2x128xbf16>
    %cst_80 = arith.constant dense<0.000000e+00> : vector<2x128xf32>
    %158 = tpu.matmul %157, %156, %cst_80 {dimension_numbers = #tpu.dot_dimension_numbers<[1], [0], [0], [1], [0, 0, 1, 1], [], []>} : vector<2x128xbf16>, vector<128x128xbf16>, vector<2x128xf32> -> vector<2x128xf32>
    %159 = vector.extract_strided_slice %143 {offsets = [12, 0], sizes = [2, 128], strides = [1, 1]} : vector<32x128xf32> to vector<2x128xf32>
    %c3 = arith.constant 3 : index
    %c0_81 = arith.constant 0 : index
    %c0_82 = arith.constant 0 : index
    %160 = vector.load %arg9[%c3, %c0_81, %c0_82] : memref<8x128x128xbf16, #tpu.memory_space<vmem>>, vector<1x128x128xbf16>
    %161 = vector.shape_cast %160 : vector<1x128x128xbf16> to vector<128x128xbf16>
    %162 = arith.truncf %159 : vector<2x128xf32> to vector<2x128xbf16>
    %cst_83 = arith.constant dense<0.000000e+00> : vector<2x128xf32>
    %163 = tpu.matmul %162, %161, %cst_83 {dimension_numbers = #tpu.dot_dimension_numbers<[1], [0], [0], [1], [0, 0, 1, 1], [], []>} : vector<2x128xbf16>, vector<128x128xbf16>, vector<2x128xf32> -> vector<2x128xf32>
    %164 = vector.extract_strided_slice %143 {offsets = [16, 0], sizes = [2, 128], strides = [1, 1]} : vector<32x128xf32> to vector<2x128xf32>
    %c4 = arith.constant 4 : index
    %c0_84 = arith.constant 0 : index
    %c0_85 = arith.constant 0 : index
    %165 = vector.load %arg9[%c4, %c0_84, %c0_85] : memref<8x128x128xbf16, #tpu.memory_space<vmem>>, vector<1x128x128xbf16>
    %166 = vector.shape_cast %165 : vector<1x128x128xbf16> to vector<128x128xbf16>
    %167 = arith.truncf %164 : vector<2x128xf32> to vector<2x128xbf16>
    %cst_86 = arith.constant dense<0.000000e+00> : vector<2x128xf32>
    %168 = tpu.matmul %167, %166, %cst_86 {dimension_numbers = #tpu.dot_dimension_numbers<[1], [0], [0], [1], [0, 0, 1, 1], [], []>} : vector<2x128xbf16>, vector<128x128xbf16>, vector<2x128xf32> -> vector<2x128xf32>
    %169 = vector.extract_strided_slice %143 {offsets = [20, 0], sizes = [2, 128], strides = [1, 1]} : vector<32x128xf32> to vector<2x128xf32>
    %c5 = arith.constant 5 : index
    %c0_87 = arith.constant 0 : index
    %c0_88 = arith.constant 0 : index
    %170 = vector.load %arg9[%c5, %c0_87, %c0_88] : memref<8x128x128xbf16, #tpu.memory_space<vmem>>, vector<1x128x128xbf16>
    %171 = vector.shape_cast %170 : vector<1x128x128xbf16> to vector<128x128xbf16>
    %172 = arith.truncf %169 : vector<2x128xf32> to vector<2x128xbf16>
    %cst_89 = arith.constant dense<0.000000e+00> : vector<2x128xf32>
    %173 = tpu.matmul %172, %171, %cst_89 {dimension_numbers = #tpu.dot_dimension_numbers<[1], [0], [0], [1], [0, 0, 1, 1], [], []>} : vector<2x128xbf16>, vector<128x128xbf16>, vector<2x128xf32> -> vector<2x128xf32>
    %174 = vector.extract_strided_slice %143 {offsets = [24, 0], sizes = [2, 128], strides = [1, 1]} : vector<32x128xf32> to vector<2x128xf32>
    %c6 = arith.constant 6 : index
    %c0_90 = arith.constant 0 : index
    %c0_91 = arith.constant 0 : index
    %175 = vector.load %arg9[%c6, %c0_90, %c0_91] : memref<8x128x128xbf16, #tpu.memory_space<vmem>>, vector<1x128x128xbf16>
    %176 = vector.shape_cast %175 : vector<1x128x128xbf16> to vector<128x128xbf16>
    %177 = arith.truncf %174 : vector<2x128xf32> to vector<2x128xbf16>
    %cst_92 = arith.constant dense<0.000000e+00> : vector<2x128xf32>
    %178 = tpu.matmul %177, %176, %cst_92 {dimension_numbers = #tpu.dot_dimension_numbers<[1], [0], [0], [1], [0, 0, 1, 1], [], []>} : vector<2x128xbf16>, vector<128x128xbf16>, vector<2x128xf32> -> vector<2x128xf32>
    %179 = vector.extract_strided_slice %143 {offsets = [28, 0], sizes = [2, 128], strides = [1, 1]} : vector<32x128xf32> to vector<2x128xf32>
    %c7 = arith.constant 7 : index
    %c0_93 = arith.constant 0 : index
    %c0_94 = arith.constant 0 : index
    %180 = vector.load %arg9[%c7, %c0_93, %c0_94] : memref<8x128x128xbf16, #tpu.memory_space<vmem>>, vector<1x128x128xbf16>
    %181 = vector.shape_cast %180 : vector<1x128x128xbf16> to vector<128x128xbf16>
    %182 = arith.truncf %179 : vector<2x128xf32> to vector<2x128xbf16>
    %cst_95 = arith.constant dense<0.000000e+00> : vector<2x128xf32>
    %183 = tpu.matmul %182, %181, %cst_95 {dimension_numbers = #tpu.dot_dimension_numbers<[1], [0], [0], [1], [0, 0, 1, 1], [], []>} : vector<2x128xbf16>, vector<128x128xbf16>, vector<2x128xf32> -> vector<2x128xf32>
    %184 = arith.addf %148, %153 : vector<2x128xf32>
    %185 = arith.addf %158, %163 : vector<2x128xf32>
    %186 = arith.addf %168, %173 : vector<2x128xf32>
    %187 = arith.addf %178, %183 : vector<2x128xf32>
    %188 = arith.addf %184, %185 : vector<2x128xf32>
    %189 = arith.addf %186, %187 : vector<2x128xf32>
    %190 = arith.addf %188, %189 : vector<2x128xf32>
    %c0_96 = arith.constant 0 : index
    %c0_97 = arith.constant 0 : index
    %191 = vector.load %arg10[%c0_96, %c0_97] : memref<1x128xf32, #tpu.memory_space<vmem>>, vector<1x128xf32>
    %192 = vector.broadcast %191 : vector<1x128xf32> to vector<2x128xf32>
    %193 = arith.addf %190, %192 : vector<2x128xf32>
    %c0_98 = arith.constant 0 : index
    %c0_99 = arith.constant 0 : index
    %194 = vector.load %arg11[%c0_98, %c0_99] : memref<2x128xf32, #tpu.memory_space<vmem>>, vector<2x128xf32>
    tpu.vector_store %arg11[%c0_98, %c0_99], %193 {strides = array<i32>} : memref<2x128xf32, #tpu.memory_space<vmem>>, vector<2x128xf32>,
    return
  }
}

</mosaic_0001>

<bundles_post_ra>
// kernel: tile.33
= control target key start
LH: loop header
LB: loop body
LE: loop exit
PB: predicated region body
PF: predicated region fallthrough
CT: control target
= control target key end

     0   :  { %s28_s0 = inlined_call_operand.vmem [shape: f32[8], index: 0, kind: input, shape index: {}]   ;;  %s29_s1 = inlined_call_operand.vmem [shape: f32[16,8], index: 1, kind: output, shape index: {}]  }
   0x1   :  { %v4_v0 = vld [vmem:[%s28_s0] ss:$0 sm:$0xff] }
   0x2   :  { %5 = vst [vmem:[%s29_s1] sm:$0xff] %v4_v0 }
   0x3   :  { %8 = vst [vmem:[%s29_s1 + $0x8] sm:$0xff] %v4_v0 }

// kernel: tile.34
= control target key start
LH: loop header
LB: loop body
LE: loop exit
PB: predicated region body
PF: predicated region fallthrough
CT: control target
= control target key end

     0   :  { %s131_s10 = smov 120   ;;  %s132_s11 = smov 104   ;;  %vm3_vm0 = vcmask 64512   ;;  %vm9_vm1 = vcmask 1048512   ;;  %vm15_vm2 = vcmask 982912   ;;  %vm21_vm3 = vcmask 917312   ;;  %s207_s0 = inlined_call_operand.vmem [shape: f32[16,8], index: 0, kind: input, shape index: {}]   ;;  %s208_s1 = inlined_call_operand.vmem [shape: f32[1,128], index: 1, kind: output, shape index: {}]  }
   0x1   :  { %v101_v0 = vld [vmem:[%s207_s0 + $0xf] sm:$0x1]   ;;  %v103_v1 = vld [vmem:[%s207_s0 + $0xd] sm:$0x1]   ;;  %v105_v2 = vld [vmem:[%s207_s0 + $0xb] sm:$0x1]  }
   0x2   :  { %7 = vrot.lane.b32.xlu0 %v101_v0, %s131_s10  ;;  %19 = vrot.lane.b32.xlu1 %v103_v1, %s132_s11  ;;  %s133_s14 = smov 88   ;;  %v102_v3 = vld [vmem:[%s207_s0 + $0xe] sm:$0x1]   ;;  %v104_v4 = vld [vmem:[%s207_s0 + $0xc] sm:$0x1]   ;;  %s134_s19 = smov 112  }
   0x3   :  { %31 = vrot.lane.b32.xlu2 %v105_v2, %s133_s14  ;;  %s135_s20 = smov 96   ;;  %v106_v5 = vld [vmem:[%s207_s0 + $0xa] sm:$0x1]   ;;  %s136_s23 = smov 80   ;;  %v107_v6 = vld [vmem:[%s207_s0 + $0x9] sm:$0x1]  }
   0x4   :  { %v108_v7 = vld [vmem:[%s207_s0 + $0x8] sm:$0x1]   ;;  %s137_s28 = smov 72   ;;  %s138_s29 = smov 64   ;;  %v109_v8 = vld [vmem:[%s207_s0 + $0x7] sm:$0x1]  }
   0x5   :  { %s139_s3 = smov 56   ;;  %v110_v9 = vld [vmem:[%s207_s0 + $0x6] sm:$0x1]   ;;  %v111_v10 = vld [vmem:[%s207_s0 + $0x5] sm:$0x1]   ;;  %s140_s8 = smov 48  }
   0x6   :  { %s141_s9 = smov 40   ;;  %v112_v11 = vld [vmem:[%s207_s0 + $0x4] sm:$0x1]   ;;  %s142_s12 = smov 32   ;;  %v113_v12 = vld [vmem:[%s207_s0 + $0x3] sm:$0x1]  }
   0x7   :  { %v114_v13 = vld [vmem:[%s207_s0 + $0x2] sm:$0x1]   ;;  %s143_s17 = smov 24   ;;  %s144_s18 = smov 16   ;;  %v115_v14 = vld [vmem:[%s207_s0 + $0x1] sm:$0x1]  }
   0x8   :  { %s145_s21 = smov 8   ;;  %v2_v15 = vld [vmem:[%s207_s0] sm:$0x1]   ;;  %vm27_vm4 = vcmask 851712   ;;  %vm33_vm5 = vcmask 786112   ;;  %vm39_vm6 = vcmask 720512  }
   0x9   :  { %4 = vst.msk [vmem:[#allocation0] sm:$0x1] %vm3_vm0, %v2_v15   ;;  %vm45_vm7 = vcmask 654912   ;;  %vm51_vm8 = vcmask 589312   ;;  %vm57_vm9 = vcmask 523712   ;;  %vm63_vm10 = vcmask 458112  }
   0xa   :  { %13 = vrot.lane.b32.xlu0 %v102_v3, %s134_s19  ;;  %25 = vrot.lane.b32.xlu1 %v104_v4, %s135_s20  ;;  %vm69_vm11 = vcmask 392512   ;;  %vm75_vm12 = vcmask 326912   ;;  %vm81_vm13 = vcmask 261312   ;;  %vm87_vm14 = vcmask 195712  }
   0xb   :  { %37 = vrot.lane.b32.xlu2 %v106_v5, %s136_s23  ;;  %vm93_vm15 = vcmask 130112  }
  0x12   :  { %43 = vrot.lane.b32.xlu0 %v107_v6, %s137_s28  ;;  %49 = vrot.lane.b32.xlu1 %v108_v7, %s138_s29 }
  0x13   :  { %55 = vrot.lane.b32.xlu2 %v109_v8, %s139_s3 }
  0x1a   :  { %61 = vrot.lane.b32.xlu0 %v110_v9, %s140_s8  ;;  %67 = vrot.lane.b32.xlu1 %v111_v10, %s141_s9 }
  0x1b   :  { %73 = vrot.lane.b32.xlu2 %v112_v11, %s142_s12 }
  0x22   :  { %79 = vrot.lane.b32.xlu0 %v113_v12, %s143_s17  ;;  %85 = vrot.lane.b32.xlu1 %v114_v13, %s144_s18 }
  0x23   :  { %91 = vrot.lane.b32.xlu2 %v115_v14, %s145_s21 }
  0x5d   :  { %v32_v16 = vpop.permute.xlu2 %31  }
  0x65   :  { %v38_v17 = vpop.permute.xlu2 %37  }
  0x6d   :  { %v56_v18 = vpop.permute.xlu2 %55  }
  0x74   :  { %v8_v19 = vpop.permute.xlu0 %7   ;;  %v20_v20 = vpop.permute.xlu1 %19  }
  0x75   :  { %10 = vst.msk [vmem:[#allocation0] sm:$0x1] %vm9_vm1, %v8_v19   ;;  %v74_v21 = vpop.permute.xlu2 %73  }
  0x7c   :  { %v14_v22 = vpop.permute.xlu0 %13   ;;  %v26_v23 = vpop.permute.xlu1 %25  }
  0x7d   :  { %16 = vst.msk [vmem:[#allocation0] sm:$0x1] %vm15_vm2, %v14_v22   ;;  %v92_v24 = vpop.permute.xlu2 %91  }
  0x7e   :  { %22 = vst.msk [vmem:[#allocation0] sm:$0x1] %vm21_vm3, %v20_v20  }
  0x7f   :  { %28 = vst.msk [vmem:[#allocation0] sm:$0x1] %vm27_vm4, %v26_v23  }
  0x80   :  { %34 = vst.msk [vmem:[#allocation0] sm:$0x1] %vm33_vm5, %v32_v16  }
  0x81   :  { %40 = vst.msk [vmem:[#allocation0] sm:$0x1] %vm39_vm6, %v38_v17  }
  0x84   :  { %v44_v25 = vpop.permute.xlu0 %43   ;;  %v50_v26 = vpop.permute.xlu1 %49  }
  0x85   :  { %46 = vst.msk [vmem:[#allocation0] sm:$0x1] %vm45_vm7, %v44_v25  }
  0x86   :  { %52 = vst.msk [vmem:[#allocation0] sm:$0x1] %vm51_vm8, %v50_v26  }
  0x87   :  { %58 = vst.msk [vmem:[#allocation0] sm:$0x1] %vm57_vm9, %v56_v18  }
  0x8c   :  { %v62_v27 = vpop.permute.xlu0 %61   ;;  %v68_v28 = vpop.permute.xlu1 %67  }
  0x8d   :  { %64 = vst.msk [vmem:[#allocation0] sm:$0x1] %vm63_vm10, %v62_v27  }
  0x8e   :  { %70 = vst.msk [vmem:[#allocation0] sm:$0x1] %vm69_vm11, %v68_v28  }
  0x8f   :  { %76 = vst.msk [vmem:[#allocation0] sm:$0x1] %vm75_vm12, %v74_v21  }
  0x94   :  { %v80_v29 = vpop.permute.xlu0 %79   ;;  %v86_v30 = vpop.permute.xlu1 %85  }
  0x95   :  { %82 = vst.msk [vmem:[#allocation0] sm:$0x1] %vm81_vm13, %v80_v29  }
  0x96   :  { %88 = vst.msk [vmem:[#allocation0] sm:$0x1] %vm87_vm14, %v86_v30  }
  0x97   :  { %94 = vst.msk [vmem:[#allocation0] sm:$0x1] %vm93_vm15, %v92_v24  }
  0x9e   :  { %v97_v31 = vld [vmem:[#allocation0] sm:$0x1] }
  0x9f   :  { %100 = vst [vmem:[%s208_s1] sm:$0x1] %v97_v31 }

// kernel: generate_net_forward.1
= control target key start
LH: loop header
LB: loop body
LE: loop exit
PB: predicated region body
PF: predicated region fallthrough
CT: control target
= control target key end

     0   :  { %v45_v3 = vlaneseq  ;;  %s2722_s0 = inlined_call_operand.vmem [shape: f32[32,64], index: 0, kind: input, shape index: {}]   ;;  %s2723_s1 = inlined_call_operand.vmem [shape: bf16[3,64,128], index: 1, kind: input, shape index: {}]   ;;  %s2724_s2 = inlined_call_operand.vmem [shape: f32[1,128], index: 2, kind: input, shape index: {}]   ;;  %s2725_s3 = inlined_call_operand.vmem [shape: f32[1,128], index: 3, kind: input, shape index: {}]   ;;  %s2726_s4 = inlined_call_operand.vmem [shape: f32[1,128], index: 4, kind: input, shape index: {}]   ;;  %s2727_s5 = inlined_call_operand.vmem [shape: bf16[3,128,128], index: 5, kind: input, shape index: {}]   ;;  %s2728_s6 = inlined_call_operand.vmem [shape: f32[1,128], index: 6, kind: input, shape index: {}]   ;;  %s2729_s7 = inlined_call_operand.vmem [shape: f32[1,128], index: 7, kind: input, shape index: {}]   ;;  %s2730_s8 = inlined_call_operand.vmem [shape: f32[1,128], index: 8, kind: input, shape index: {}]   ;;  %s2731_s9 = inlined_call_operand.vmem [shape: bf16[8,128,128], index: 9, kind: input, shape index: {}]   ;;  %s2732_s10 = inlined_call_operand.vmem [shape: f32[1,128], index: 10, kind: input, shape index: {}]   ;;  %s2733_s11 = inlined_call_operand.hbm [shape: f32[2,128], index: 11, kind: output, shape index: {}]  }
   0x1   :  { %v2008_v0 = vld [vmem:[%s2723_s1 + $0x18] sm:$0xff]  ;;  %v2007_v4 = vld [vmem:[%s2723_s1 + $0x10] sm:$0xff]  ;;  %v40_v8 = vld [vmem:[%s2722_s0] sm:$0xff] }
   0x2   :  { %v2004_v1 = vld [vmem:[%s2723_s1 + $0x38] sm:$0xff]  ;;  %139 = vmatpush.bf16.msra.mxu0 %v2008_v0  ;;  %v2003_v5 = vld [vmem:[%s2723_s1 + $0x30] sm:$0xff]  ;;  %v2233_v6 = vshrl.u32 %v45_v3, 7  ;;  %v41_v9 = vld [vmem:[%s2722_s0 + $0x8] sm:$0xff]  ;;  %v54_v12 = vrot.slane %v40_v8, 6  ;;  %v70_v18 = vrot.slane %v40_v8, 2 }
   0x3   :  { %v2012_v2 = vld [vmem:[%s2723_s1 + $0x58] sm:$0xff]  ;;  %188 = vmatpush.bf16.msra.mxu1 %v2004_v1  ;;  %v2011_v7 = vld [vmem:[%s2723_s1 + $0x50] sm:$0xff]  ;;  %v2006_v11 = vld [vmem:[%s2723_s1 + $0x8] sm:$0xff]  ;;  %v55_v17 = vrot.slane %v41_v9, 6  ;;  %v71_v20 = vrot.slane %v41_v9, 2 }
   0x4   :  { %248 = vmatpush.bf16.msra.mxu2 %v2012_v2  ;;  %v43_v10 = vld [vmem:[%s2722_s0 + $0x18] sm:$0xff]  ;;  %vm50_vm0 = vcmp.lt.s32.totalorder %v2233_v6, 2  ;;  %v42_v14 = vld [vmem:[%s2722_s0 + $0x10] sm:$0xff]  ;;  %v2002_v15 = vld [vmem:[%s2723_s1 + $0x28] sm:$0xff] }
   0x5   :  { %v57_v13 = vrot.slane %v43_v10, 6  ;;  %v2010_v16 = vld [vmem:[%s2723_s1 + $0x48] sm:$0xff]  ;;  %v72_v21 = vrot.slane %v42_v14, 2 }
   0x6   :  { %140 = vmatpush.bf16.msra.mxu0 %v2007_v4 }
   0x7   :  { %189 = vmatpush.bf16.msra.mxu1 %v2003_v5  ;;  %v61_v19 = vsel %vm50_vm0, %v57_v13, %v54_v12 }
   0x8   :  { %249 = vmatpush.bf16.msra.mxu2 %v2011_v7 }
   0x9   :  { %16 = vsyncpa [#allocation3], 0  ;;  %vm74_vm1 = vcmp.lt.s32.totalorder %v2233_v6, 6  ;;  %v2005_v22 = vld [vmem:[%s2723_s1] sm:$0xff]  ;;  %v60_v24 = vsel %vm50_vm0, %v54_v12, %v55_v17  ;;  %v62_v25 = vsel %vm50_vm0, 0.0, %v61_v19  ;;  %v92_v30 = vpack.c.bf16 %v41_v9, %v40_v8  ;;  %s2152_s30 = smov 16  }
   0xa   :  { %141 = vmatpush.bf16.msra.mxu0 %v2006_v11  ;;  %v2001_v23 = vld [vmem:[%s2723_s1 + $0x20] sm:$0xff]  ;;  %v76_v27 = vsel %vm74_vm1, %v71_v20, %v72_v21  ;;  %v77_v28 = vsel %vm74_vm1, %v70_v18, %v71_v20  ;;  %v102_v29 = vpack.c.bf16 %v60_v24, %v62_v25  ;;  %vm128_vm2 = vcmask 523264   ;;  %s2153_s12 = smov 32   ;;  %s2154_s13 = smov 64   ;;  %vm1545_vm7 = vmneg %vm50_vm0 }
   0xb   :  { %190 = vmatpush.bf16.msra.mxu1 %v2002_v15  ;;  %v2009_v26 = vld [vmem:[%s2723_s1 + $0x40] sm:$0xff]  ;;  %v212_v31 = vpack.c.bf16 %v76_v27, %v77_v28  ;;  %v2284_v32 = vadd.s32 24, %v2233_v6  ;;  %v73_v33 = vrot.slane %v43_v10, 2  ;;  %v56_v34 = vrot.slane %v42_v14, 6  ;;  %s2157_s27 = smov [#allocation2]  }
   0xc   :  { %250 = vmatpush.bf16.msra.mxu2 %v2010_v16  ;;  %v93_v41 = vpack.c.bf16 %v43_v10, %v42_v14  ;;  %v2118_v57 = vld [vmem:[%s2724_s2] ss:$0 sm:$0xff]  ;;  %s2151_s2 = smov 8   ;;  %vm2155_vm8 = vmmov 1  }
   0xd   :  { %vm69_vm3 = vcmp.ge.s32.totalorder %v2284_v32, 30  ;;  %v78_v35 = vsel %vm74_vm1, %v73_v33, %v70_v18  ;;  %v58_v36 = vsel %vm50_vm0, %v56_v34, %v57_v13  ;;  %v59_v37 = vsel %vm50_vm0, %v55_v17, %v56_v34  ;;  %vm1546_vm9 = vmpackc.low %vm2155_vm8, %vm1545_vm7 }
   0xe   :  { %142 = vmatpush.bf16.msra.mxu0 %v2005_v22  ;;  %v75_v38 = vsel %vm74_vm1, %v72_v21, %v73_v33  ;;  %v82_v39 = vsel %vm69_vm3, 0.0, %v78_v35  ;;  %v103_v40 = vpack.c.bf16 %v58_v36, %v59_v37  ;;  %vm1629_vm10 = vmneg %vm69_vm3 }
   0xf   :  { %191 = vmatpush.bf16.msra.mxu1 %v2001_v23  ;;  %v213_v42 = vpack.c.bf16 %v82_v39, %v75_v38  ;;  %vm1630_vm11 = vmpackc.low %vm1629_vm10, %vm2155_vm8 }
  0x10   :  { %251 = vmatpush.bf16.msra.mxu2 %v2009_v26 }
  0x11   :  { %1451 = vmatmul.msk.bf16.vlgmr.msra.gmra.mxu0 %vm128_vm2, %v102_v29 }
  0x12   :  { %1469 = vmatmul.msk.bf16.vlgmr.msra.gmra.mxu1 %vm128_vm2, %v92_v30 }
  0x13   :  { %1495 = vmatmul.msk.bf16.vlgmr.msra.gmra.mxu2 %vm128_vm2, %v212_v31 }
  0x21   :  { %1452 = vmatmul.msk.bf16.gmra.mxu0 %vm128_vm2, %v103_v40  ;;  %v2020_v40 = vld [vmem:[%s2727_s5 + $0x78] sm:$0xff] }
  0x22   :  { %1470 = vmatmul.msk.bf16.gmra.mxu1 %vm128_vm2, %v93_v41  ;;  %535 = vmatpush.bf16.msrb.mxu0 %v2020_v40  ;;  %v2028_v41 = vld [vmem:[%s2727_s5 + $0x38] sm:$0xff] }
  0x23   :  { %1496 = vmatmul.msk.bf16.gmra.mxu2 %vm128_vm2, %v213_v42  ;;  %v2036_v42 = vld [vmem:[%s2727_s5 + $0xb8] sm:$0xff]  ;;  %468 = vmatpush.bf16.msra.mxu3 %v2028_v41 }
  0x24   :  { %621 = vmatpush.bf16.msrb.mxu1 %v2036_v42 }
  0x8e   :  { %v144_v43 = vpop.f32.mrf.mxu0 }
  0x8f   :  { %v193_v44 = vpop.f32.mrf.mxu1 }
  0x90   :  { %v194_v51 = vadd.f32 %v193_v44, %v144_v43  ;;  %v2019_v43 = vld [vmem:[%s2727_s5 + $0x70] sm:$0xff] }
  0x91   :  { %536 = vmatpush.bf16.msrb.mxu0 %v2019_v43  ;;  %v2027_v44 = vld [vmem:[%s2727_s5 + $0x30] sm:$0xff] }
  0x92   :  { %469 = vmatpush.bf16.msra.mxu3 %v2027_v44 }
  0x96   :  { %v253_v45 = vpop.f32.mrf.mxu2  ;;  %v146_v46 = vpop.f32.mrf.mxu0 }
  0x97   :  { %v195_v47 = vpop.f32.mrf.mxu1  ;;  %v263_v56 = vadd.f32 %v253_v45, %v194_v51  ;;  %v2035_v45 = vld [vmem:[%s2727_s5 + $0xb0] sm:$0xff]  ;;  %v2033_v51 = vld [vmem:[%s2727_s5 + $0xa0] sm:$0xff] }
  0x98   :  { %v196_v52 = vadd.f32 %v195_v47, %v146_v46  ;;  %v2018_v46 = vld [vmem:[%s2727_s5 + $0x68] sm:$0xff]  ;;  %622 = vmatpush.bf16.msrb.mxu1 %v2035_v45 }
  0x99   :  { %v2305_v62 = vadd.f32 %v2118_v57, %v263_v56  ;;  %537 = vmatpush.bf16.msrb.mxu0 %v2018_v46  ;;  %v2026_v47 = vld [vmem:[%s2727_s5 + $0x28] sm:$0xff]  ;;  %v2032_v56 = vld [vmem:[%s2727_s5 + $0x98] sm:$0xff] }
  0x9a   :  { %470 = vmatpush.bf16.msra.mxu3 %v2026_v47 }
  0x9b   :  { %v285_v3 = vmul.f32 %v2305_v62, %v2305_v62 }
  0x9e   :  { %v255_v48 = vpop.f32.mrf.mxu2  ;;  %v149_v49 = vpop.f32.mrf.mxu0 }
  0x9f   :  { %v198_v50 = vpop.f32.mrf.mxu1  ;;  %v264_v54 = vadd.f32 %v255_v48, %v196_v52  ;;  %v2034_v48 = vld [vmem:[%s2727_s5 + $0xa8] sm:$0xff] }
  0xa0   :  { %v199_v53 = vadd.f32 %v198_v50, %v149_v49  ;;  %v2017_v49 = vld [vmem:[%s2727_s5 + $0x60] sm:$0xff]  ;;  %623 = vmatpush.bf16.msrb.mxu1 %v2034_v48 }
  0xa1   :  { %v2303_v59 = vadd.f32 %v2118_v57, %v264_v54  ;;  %538 = vmatpush.bf16.msrb.mxu0 %v2017_v49  ;;  %v2025_v50 = vld [vmem:[%s2727_s5 + $0x20] sm:$0xff] }
  0xa2   :  { %471 = vmatpush.bf16.msra.mxu3 %v2025_v50 }
  0xa3   :  { %v286_v0 = vmul.f32 %v2303_v59, %v2303_v59  ;;  %v276_v4 = vadd.f32 %v2303_v59, %v2305_v62 }
  0xa4   :  { %624 = vmatpush.bf16.msrb.mxu1 %v2033_v51 }
  0xa5   :  { %v289_v8 = vadd.f32 %v286_v0, %v285_v3  ;;  %v2022_v3 = vld [vmem:[%s2727_s5 + $0x8] sm:$0xff] }
  0xa6   :  { %v258_v55 = vpop.f32.mrf.mxu2  ;;  %v151_v60 = vpop.f32.mrf.mxu0 }
  0xa7   :  { %v265_v58 = vadd.f32 %v258_v55, %v199_v53  ;;  %v200_v61 = vpop.f32.mrf.mxu1  ;;  %v2016_v53 = vld [vmem:[%s2727_s5 + $0x58] sm:$0xff] }
  0xa8   :  { %v201_v1 = vadd.f32 %v200_v61, %v151_v60  ;;  %539 = vmatpush.bf16.msrb.mxu0 %v2016_v53  ;;  %v2024_v55 = vld [vmem:[%s2727_s5 + $0x18] sm:$0xff]  ;;  %625 = vmatpush.bf16.msrb.mxu1 %v2032_v56  ;;  %v2023_v60 = vld [vmem:[%s2727_s5 + $0x10] sm:$0xff] }
  0xa9   :  { %v2307_v63 = vadd.f32 %v2118_v57, %v265_v58  ;;  %472 = vmatpush.bf16.msra.mxu3 %v2024_v55  ;;  %v2031_v61 = vld [vmem:[%s2727_s5 + $0x90] sm:$0xff] }
  0xab   :  { %v287_v5 = vmul.f32 %v2307_v63, %v2307_v63  ;;  %v277_v9 = vadd.f32 %v276_v4, %v2307_v63  ;;  %v2030_v4 = vld [vmem:[%s2727_s5 + $0x88] sm:$0xff] }
  0xac   :  { %626 = vmatpush.bf16.msrb.mxu1 %v2031_v61 }
  0xad   :  { %v290_v11 = vadd.f32 %v289_v8, %v287_v5  ;;  %473 = vmatpush.bf16.msra.mxu3 %v2023_v60  ;;  %v2013_v5 = vld [vmem:[%s2727_s5 + $0x40] sm:$0xff] }
  0xae   :  { %v260_v2 = vpop.f32.mrf.mxu2 }
  0xaf   :  { %v266_v7 = vadd.f32 %v260_v2, %v201_v1  ;;  %v2014_v1 = vld [vmem:[%s2727_s5 + $0x48] sm:$0xff] }
  0xb0   :  { %627 = vmatpush.bf16.msrb.mxu1 %v2030_v4 }
  0xb1   :  { %v2318_v10 = vadd.f32 %v2118_v57, %v266_v7  ;;  %v2015_v57 = vld [vmem:[%s2727_s5 + $0x50] sm:$0xff]  ;;  %474 = vmatpush.bf16.msra.mxu3 %v2022_v3 }
  0xb2   :  { %540 = vmatpush.bf16.msrb.mxu0 %v2015_v57 }
  0xb3   :  { %v278_v12 = vadd.f32 %v277_v9, %v2318_v10  ;;  %v288_v13 = vmul.f32 %v2318_v10, %v2318_v10 }
  0xb5   :  { %v291_v14 = vadd.f32 %v290_v11, %v288_v13  ;;  %v279_v15 = vrot.slane %v278_v12, 4  ;;  %v2021_v11 = vld [vmem:[%s2727_s5] sm:$0xff] }
  0xb6   :  { %541 = vmatpush.bf16.msrb.mxu0 %v2014_v1  ;;  %v2029_v13 = vld [vmem:[%s2727_s5 + $0x80] sm:$0xff]  ;;  %475 = vmatpush.bf16.msra.mxu3 %v2021_v11  ;;  %s1416_s5 = sshll.u32 %s2157_s27, 4  ;;  %s1417_s5 = int_to_ptr.vmem [resolvable:$true] %s1416_s5 }
  0xb7   :  { %v280_v16 = vadd.f32 %v279_v15, %v278_v12  ;;  %v292_v17 = vrot.slane %v291_v14, 4  ;;  %628 = vmatpush.bf16.msrb.mxu1 %v2029_v13  ;;  %v2119_v13 = vld [vmem:[%s2728_s6] ss:$0 sm:$0xff]  ;;  %s1418_s6 = sshll.u32 %s2733_s11, 4  ;;  %s1419_s6 = int_to_ptr.hbm [resolvable:$true] %s1418_s6 }
  0xb9   :  { %v281_v18 = vrot.slane %v280_v16, 2  ;;  %v293_v19 = vadd.f32 %v292_v17, %v291_v14 }
  0xba   :  { %542 = vmatpush.bf16.msrb.mxu0 %v2013_v5 }
  0xbb   :  { %v282_v20 = vadd.f32 %v281_v18, %v280_v16  ;;  %v294_v21 = vrot.slane %v293_v19, 2 }
  0xbd   :  { %v283_v22 = vrot.slane %v282_v20, 1  ;;  %v295_v24 = vadd.f32 %v294_v21, %v293_v19  ;;  %v274_v19 = vld [vmem:[%s2725_s3] sm:$0x1] }
  0xbf   :  { %v284_v23 = vadd.f32 %v283_v22, %v282_v20  ;;  %v296_v25 = vrot.slane %v295_v24, 1 }
  0xc1   :  { %298 = vrot.lane.b32.xlu0 %v284_v23, %s2151_s2  ;;  %v297_v26 = vadd.f32 %v296_v25, %v295_v24 }
  0xc9   :  { %301 = vrot.lane.b32.xlu0 %v297_v26, %s2151_s2 }
 0x133   :  { %v299_v27 = vpop.permute.xlu0 %298 }
 0x134   :  { %v300_v28 = vadd.f32 %v299_v27, %v284_v23  ;;  %v275_v23 = vld [vmem:[%s2726_s4] sm:$0x1] }
 0x136   :  { %304 = vrot.lane.b32.xlu1 %v300_v28, %s2152_s30 }
 0x13b   :  { %v302_v29 = vpop.permute.xlu0 %301 }
 0x13c   :  { %v303_v30 = vadd.f32 %v302_v29, %v297_v26 }
 0x13e   :  { %307 = vrot.lane.b32.xlu1 %v303_v30, %s2152_s30 }
 0x1a8   :  { %v305_v31 = vpop.permute.xlu1 %304 }
 0x1a9   :  { %v306_v33 = vadd.f32 %v305_v31, %v300_v28 }
 0x1ab   :  { %310 = vrot.lane.b32.xlu2 %v306_v33, %s2153_s12 }
 0x1b0   :  { %v308_v34 = vpop.permute.xlu1 %307 }
 0x1b1   :  { %v309_v35 = vadd.f32 %v308_v34, %v303_v30 }
 0x1b3   :  { %313 = vrot.lane.b32.xlu2 %v309_v35, %s2153_s12 }
 0x205   :  { %v311_v36 = vpop.permute.xlu2 %310 }
 0x206   :  { %v312_v37 = vadd.f32 %v311_v36, %v306_v33 }
 0x208   :  { %316 = vrot.lane.b32.xlu0 %v312_v37, %s2154_s13 }
 0x20d   :  { %v314_v38 = vpop.permute.xlu2 %313 }
 0x20e   :  { %v315_v39 = vadd.f32 %v314_v38, %v309_v35 }
 0x210   :  { %319 = vrot.lane.b32.xlu1 %v315_v39, %s2154_s13 }
 0x27a   :  { %v317_v52 = vpop.permute.xlu0 %316 }
 0x27b   :  { %v318_v54 = vadd.f32 %v317_v52, %v312_v37 }
 0x27d   :  { %v322_v58 = vmul.f32 0.001953125, %v318_v54 }
 0x27f   :  { %v324_v7 = vmul.f32 %v322_v58, %v322_v58 }
 0x282   :  { %v320_v0 = vpop.permute.xlu1 %319 }
 0x283   :  { %v321_v2 = vadd.f32 %v320_v0, %v315_v39 }
 0x285   :  { %v323_v8 = vmul.f32 0.001953125, %v321_v2 }
 0x287   :  { %v325_v9 = vsub.f32 %v323_v8, %v324_v7 }
 0x289   :  { %v326_v12 = vadd.f32 1e-05, %v325_v9 }
 0x28b   :  { %2121 = vrsqrt.f32 %v326_v12  ;;  %vm333_vm5 = vweird.f32 %v326_v12 }
 0x291   :  { %v2122_v14 = vpop.eup %2121 }
 0x292   :  { %v328_v15 = vmul.f32 %v2122_v14, %v326_v12  ;;  %vm334_vm4 = vweird.f32 %v2122_v14 }
 0x293   :  { %vm335_vm6 = vmor %vm333_vm5, %vm334_vm4 }
 0x294   :  { %v329_v16 = vmul.f32 %v2122_v14, %v328_v15 }
 0x296   :  { %v330_v17 = vmul.f32 0.5, %v329_v16 }
 0x298   :  { %v331_v18 = vsub.f32 1.5, %v330_v17 }
 0x29a   :  { %v332_v20 = vmul.f32 %v2122_v14, %v331_v18 }
 0x29c   :  { %v336_v21 = vsel %vm335_vm6, %v2122_v14, %v332_v20 }
 0x29d   :  { %v337_v22 = vmul.f32 %v336_v21, %v274_v19 }
 0x29f   :  { %v338_v24 = vmul.f32 %v337_v22, %v322_v58  ;;  %v341_v25 = vperm.slane %v337_v22, 0 }
 0x2a1   :  { %v339_v26 = vsub.f32 %v275_v23, %v338_v24  ;;  %v343_v27 = vmul.f32 %v341_v25, %v2305_v62  ;;  %v344_v29 = vmul.f32 %v341_v25, %v2303_v59  ;;  %v346_v30 = vmul.f32 %v341_v25, %v2318_v10 }
 0x2a2   :  { %v345_v31 = vmul.f32 %v341_v25, %v2307_v63 }
 0x2a3   :  { %v348_v28 = vperm.slane %v339_v26, 0 }
 0x2a5   :  { %v350_v33 = vadd.f32 %v348_v28, %v343_v27  ;;  %v351_v34 = vadd.f32 %v348_v28, %v344_v29  ;;  %v353_v35 = vadd.f32 %v348_v28, %v346_v30  ;;  %v352_v36 = vadd.f32 %v348_v28, %v345_v31 }
 0x2a7   :  { %v2413_v37 = vmax.f32 %v350_v33, 0.0  ;;  %v2415_v38 = vmax.f32 %v351_v34, 0.0  ;;  %v2417_v39 = vmax.f32 %v353_v35, 0.0  ;;  %v2419_v40 = vmax.f32 %v352_v36, 0.0 }
 0x2a9   :  { %v400_v59 = vpack.c.bf16 %v2415_v38, %v2413_v37  ;;  %v359_v62 = vrot.slane %v2413_v37, 6  ;;  %v360_v63 = vrot.slane %v2415_v38, 6  ;;  %v362_v10 = vrot.slane %v2417_v39, 6 }
 0x2aa   :  { %v371_v41 = vrot.slane %v2413_v37, 2  ;;  %v372_v42 = vrot.slane %v2415_v38, 2  ;;  %v373_v43 = vrot.slane %v2419_v40, 2  ;;  %v361_v50 = vrot.slane %v2419_v40, 6 }
 0x2ab   :  { %543 = vmatmul.bf16.vlgmr.msrb.gmra.mxu0 %v400_v59  ;;  %v365_v44 = vsel %vm50_vm0, %v359_v62, %v360_v63  ;;  %v366_v45 = vsel %vm50_vm0, %v362_v10, %v359_v62  ;;  %v374_v51 = vrot.slane %v2417_v39, 2  ;;  %v401_v52 = vpack.c.bf16 %v2417_v39, %v2419_v40 }
 0x2ac   :  { %v1547_v46 = vpack.c.bf16 %v365_v44, %v366_v45  ;;  %v376_v47 = vsel %vm74_vm1, %v372_v42, %v373_v43  ;;  %v377_v48 = vsel %vm74_vm1, %v371_v41, %v372_v42  ;;  %v363_v53 = vsel %vm50_vm0, %v361_v50, %v362_v10 }
 0x2ad   :  { %v571_v49 = vpack.c.bf16 %v376_v47, %v377_v48  ;;  %v364_v54 = vsel %vm50_vm0, %v360_v63, %v361_v50  ;;  %v375_v55 = vsel %vm74_vm1, %v373_v43, %v374_v51  ;;  %v378_v56 = vsel %vm74_vm1, %v374_v51, %v371_v41 }
 0x2ae   :  { %1548 = vmatmul.msk.bf16.vlgmr.msra.gmra.mxu3 %vm1546_vm9, %v1547_v46  ;;  %v419_v57 = vpack.c.bf16 %v363_v53, %v364_v54  ;;  %v1631_v58 = vpack.c.bf16 %v378_v56, %v375_v55 }
 0x2af   :  { %629 = vmatmul.bf16.vlgmr.msrb.gmra.mxu1 %v571_v49 }
 0x2bb   :  { %548 = vmatmul.bf16.gmra.mxu0 %v401_v52 }
 0x2be   :  { %481 = vmatmul.bf16.gmra.mxu3 %v419_v57 }
 0x2bf   :  { %1632 = vmatmul.msk.bf16.gmra.mxu1 %vm1630_vm11, %v1631_v58 }
 0x328   :  { %v544_v60 = vpop.f32.mrf.mxu0 }
 0x32c   :  { %v630_v61 = vpop.f32.mrf.mxu1 }
 0x330   :  { %v546_v1 = vpop.f32.mrf.mxu0 }
 0x331   :  { %v477_v0 = vpop.f32.mrf.mxu3 }
 0x332   :  { %v545_v5 = vadd.f32 %v544_v60, %v477_v0 }
 0x334   :  { %v632_v2 = vpop.f32.mrf.mxu1  ;;  %v640_v12 = vadd.f32 %v630_v61, %v545_v5 }
 0x336   :  { %v2460_v16 = vadd.f32 %v2119_v13, %v640_v12 }
 0x338   :  { %v549_v4 = vpop.f32.mrf.mxu0  ;;  %v662_v23 = vmul.f32 %v2460_v16, %v2460_v16 }
 0x339   :  { %v479_v32 = vpop.f32.mrf.mxu3 }
 0x33a   :  { %v547_v3 = vadd.f32 %v546_v1, %v479_v32 }
 0x33c   :  { %v635_v7 = vpop.f32.mrf.mxu1  ;;  %v641_v9 = vadd.f32 %v632_v2, %v547_v3 }
 0x33e   :  { %v2458_v15 = vadd.f32 %v2119_v13, %v641_v9  ;;  %v2084_v9 = vld [vmem:[%s2731_s9 + $0x178] sm:$0xff] }
 0x33f   :  { %1046 = vmatpush.bf16.msra.mxu0 %v2084_v9 }
 0x340   :  { %v551_v18 = vpop.f32.mrf.mxu0  ;;  %v663_v20 = vmul.f32 %v2458_v15, %v2458_v15  ;;  %v653_v24 = vadd.f32 %v2458_v15, %v2460_v16 }
 0x341   :  { %v482_v8 = vpop.f32.mrf.mxu3 }
 0x342   :  { %v550_v11 = vadd.f32 %v549_v4, %v482_v8  ;;  %v666_v27 = vadd.f32 %v663_v20, %v662_v23  ;;  %v2068_v20 = vld [vmem:[%s2731_s9 + $0xf8] sm:$0xff]  ;;  %v2098_v23 = vld [vmem:[%s2731_s9 + $0x1e8] sm:$0xff] }
 0x343   :  { %947 = vmatpush.bf16.msrb.mxu3 %v2068_v20  ;;  %v2090_v20 = vld [vmem:[%s2731_s9 + $0x1a8] sm:$0xff] }
 0x344   :  { %v642_v14 = vadd.f32 %v635_v7, %v550_v11  ;;  %v637_v22 = vpop.f32.mrf.mxu1  ;;  %v2100_v11 = vld [vmem:[%s2731_s9 + $0x1f8] sm:$0xff] }
 0x345   :  { %1145 = vmatpush.bf16.msra.mxu1 %v2100_v11 }
 0x346   :  { %v2462_v17 = vadd.f32 %v2119_v13, %v642_v14  ;;  %v2099_v14 = vld [vmem:[%s2731_s9 + $0x1f0] sm:$0xff] }
 0x348   :  { %v664_v25 = vmul.f32 %v2462_v17, %v2462_v17  ;;  %v654_v28 = vadd.f32 %v653_v24, %v2462_v17  ;;  %v2051_v24 = vld [vmem:[%s2731_s9 + $0x70] sm:$0xff] }
 0x349   :  { %v484_v19 = vpop.f32.mrf.mxu3  ;;  %1146 = vmatpush.bf16.msra.mxu1 %v2099_v14  ;;  %v2049_v14 = vld [vmem:[%s2731_s9 + $0x60] sm:$0xff] }
 0x34a   :  { %v552_v21 = vadd.f32 %v551_v18, %v484_v19  ;;  %v667_v30 = vadd.f32 %v666_v27, %v664_v25  ;;  %v2052_v19 = vld [vmem:[%s2731_s9 + $0x78] sm:$0xff]  ;;  %v2067_v25 = vld [vmem:[%s2731_s9 + $0xf0] sm:$0xff] }
 0x34b   :  { %848 = vmatpush.bf16.msrb.mxu2 %v2052_v19  ;;  %948 = vmatpush.bf16.msrb.mxu3 %v2067_v25  ;;  %v2074_v19 = vld [vmem:[%s2731_s9 + $0x128] sm:$0xff]  ;;  %v2047_v25 = vld [vmem:[%s2731_s9 + $0x50] sm:$0xff] }
 0x34c   :  { %v643_v26 = vadd.f32 %v637_v22, %v552_v21  ;;  %v2082_v22 = vld [vmem:[%s2731_s9 + $0x168] sm:$0xff] }
 0x34d   :  { %1147 = vmatpush.bf16.msra.mxu1 %v2098_v23  ;;  %v2073_v23 = vld [vmem:[%s2731_s9 + $0x120] sm:$0xff] }
 0x34e   :  { %v2473_v29 = vadd.f32 %v2119_v13, %v643_v26  ;;  %v2083_v13 = vld [vmem:[%s2731_s9 + $0x170] sm:$0xff]  ;;  %v651_v26 = vld [vmem:[%s2729_s7] sm:$0x1]  ;;  %s2156_s7 = smov 120  }
 0x34f   :  { %1047 = vmatpush.bf16.msra.mxu0 %v2083_v13  ;;  %849 = vmatpush.bf16.msrb.mxu2 %v2051_v24  ;;  %v2091_v13 = vld [vmem:[%s2731_s9 + $0x1b0] sm:$0xff]  ;;  %v2089_v24 = vld [vmem:[%s2731_s9 + $0x1a0] sm:$0xff] }
 0x350   :  { %v655_v31 = vadd.f32 %v654_v28, %v2473_v29  ;;  %v665_v33 = vmul.f32 %v2473_v29, %v2473_v29 }
 0x352   :  { %v656_v34 = vrot.slane %v655_v31, 4  ;;  %v668_v35 = vadd.f32 %v667_v30, %v665_v33  ;;  %v2081_v30 = vld [vmem:[%s2731_s9 + $0x160] sm:$0xff] }
 0x353   :  { %1048 = vmatpush.bf16.msra.mxu0 %v2082_v22  ;;  %v2064_v22 = vld [vmem:[%s2731_s9 + $0xd8] sm:$0xff] }
 0x354   :  { %v657_v36 = vadd.f32 %v656_v34, %v655_v31  ;;  %v669_v59 = vrot.slane %v668_v35, 4  ;;  %v2097_v31 = vld [vmem:[%s2731_s9 + $0x1e0] sm:$0xff]  ;;  %v2050_v34 = vld [vmem:[%s2731_s9 + $0x68] sm:$0xff] }
 0x355   :  { %1148 = vmatpush.bf16.msra.mxu1 %v2097_v31  ;;  %850 = vmatpush.bf16.msrb.mxu2 %v2050_v34  ;;  %v2062_v31 = vld [vmem:[%s2731_s9 + $0xc8] sm:$0xff]  ;;  %v2087_v34 = vld [vmem:[%s2731_s9 + $0x190] sm:$0xff] }
 0x356   :  { %v658_v62 = vrot.slane %v657_v36, 2  ;;  %v670_v63 = vadd.f32 %v669_v59, %v668_v35  ;;  %v652_v35 = vld [vmem:[%s2730_s8] sm:$0x1] }
 0x357   :  { %1049 = vmatpush.bf16.msra.mxu0 %v2081_v30  ;;  %v2046_v30 = vld [vmem:[%s2731_s9 + $0x48] sm:$0xff] }
 0x358   :  { %v659_v10 = vadd.f32 %v658_v62, %v657_v36  ;;  %v671_v41 = vrot.slane %v670_v63, 2  ;;  %v2066_v36 = vld [vmem:[%s2731_s9 + $0xe8] sm:$0xff] }
 0x359   :  { %949 = vmatpush.bf16.msrb.mxu3 %v2066_v36  ;;  %851 = vmatpush.bf16.msrb.mxu2 %v2049_v14  ;;  %v2061_v36 = vld [vmem:[%s2731_s9 + $0xc0] sm:$0xff] }
 0x35a   :  { %v660_v42 = vrot.slane %v659_v10, 1  ;;  %v672_v43 = vadd.f32 %v671_v41, %v670_v63  ;;  %v2080_v63 = vld [vmem:[%s2731_s9 + $0x158] sm:$0xff] }
 0x35b   :  { %1050 = vmatpush.bf16.msra.mxu0 %v2080_v63  ;;  %v2070_v63 = vld [vmem:[%s2731_s9 + $0x108] sm:$0xff] }
 0x35c   :  { %v661_v44 = vadd.f32 %v660_v42, %v659_v10  ;;  %v673_v45 = vrot.slane %v672_v43, 1  ;;  %v2096_v10 = vld [vmem:[%s2731_s9 + $0x1d8] sm:$0xff] }
 0x35d   :  { %1149 = vmatpush.bf16.msra.mxu1 %v2096_v10  ;;  %v2086_v10 = vld [vmem:[%s2731_s9 + $0x188] sm:$0xff] }
 0x35e   :  { %675 = vrot.lane.b32.xlu2 %v661_v44, %s2151_s2  ;;  %v674_v46 = vadd.f32 %v673_v45, %v672_v43 }
 0x360   :  { %678 = vrot.lane.b32.xlu0 %v674_v46, %s2151_s2 }
 0x3b8   :  { %v676_v47 = vpop.permute.xlu2 %675 }
 0x3b9   :  { %v677_v48 = vadd.f32 %v676_v47, %v661_v44  ;;  %v2079_v47 = vld [vmem:[%s2731_s9 + $0x150] sm:$0xff] }
 0x3ba   :  { %1051 = vmatpush.bf16.msra.mxu0 %v2079_v47  ;;  %v2041_v47 = vld [vmem:[%s2731_s9 + $0x20] sm:$0xff] }
 0x3bb   :  { %681 = vrot.lane.b32.xlu1 %v677_v48, %s2152_s30 }
 0x3d2   :  { %v679_v49 = vpop.permute.xlu0 %678 }
 0x3d3   :  { %v680_v50 = vadd.f32 %v679_v49, %v674_v46 }
 0x3d5   :  { %684 = vrot.lane.b32.xlu2 %v680_v50, %s2152_s30 }
 0x42d   :  { %v682_v51 = vpop.permute.xlu1 %681 }
 0x42e   :  { %v683_v52 = vadd.f32 %v682_v51, %v677_v48  ;;  %v2095_v48 = vld [vmem:[%s2731_s9 + $0x1d0] sm:$0xff] }
 0x42f   :  { %v685_v53 = vpop.permute.xlu2 %684  ;;  %1150 = vmatpush.bf16.msra.mxu1 %v2095_v48  ;;  %v2057_v48 = vld [vmem:[%s2731_s9 + $0xa0] sm:$0xff] }
 0x430   :  { %v686_v54 = vadd.f32 %v685_v53, %v680_v50  ;;  %687 = vrot.lane.b32.xlu0 %v683_v52, %s2153_s12  ;;  %v2078_v53 = vld [vmem:[%s2731_s9 + $0x148] sm:$0xff] }
 0x431   :  { %1052 = vmatpush.bf16.msra.mxu0 %v2078_v53 }
 0x432   :  { %690 = vrot.lane.b32.xlu1 %v686_v54, %s2153_s12 }
 0x4a2   :  { %v688_v55 = vpop.permute.xlu0 %687 }
 0x4a3   :  { %v689_v56 = vadd.f32 %v688_v55, %v683_v52 }
 0x4a4   :  { %v691_v57 = vpop.permute.xlu1 %690 }
 0x4a5   :  { %v692_v58 = vadd.f32 %v691_v57, %v686_v54  ;;  %693 = vrot.lane.b32.xlu2 %v689_v56, %s2154_s13  ;;  %v2094_v54 = vld [vmem:[%s2731_s9 + $0x1c8] sm:$0xff] }
 0x4a6   :  { %1151 = vmatpush.bf16.msra.mxu1 %v2094_v54  ;;  %v2039_v54 = vld [vmem:[%s2731_s9 + $0x10] sm:$0xff] }
 0x4a7   :  { %696 = vrot.lane.b32.xlu0 %v692_v58, %s2154_s13 }
 0x4ff   :  { %v694_v60 = vpop.permute.xlu2 %693 }
 0x500   :  { %v695_v61 = vadd.f32 %v694_v60, %v689_v56 }
 0x502   :  { %v699_v0 = vmul.f32 0.001953125, %v695_v61  ;;  %v2093_v61 = vld [vmem:[%s2731_s9 + $0x1c0] sm:$0xff] }
 0x503   :  { %1152 = vmatpush.bf16.msra.mxu1 %v2093_v61 }
 0x504   :  { %v701_v32 = vmul.f32 %v699_v0, %v699_v0 }
 0x519   :  { %v697_v1 = vpop.permute.xlu0 %696 }
 0x51a   :  { %v698_v2 = vadd.f32 %v697_v1, %v692_v58 }
 0x51c   :  { %v700_v3 = vmul.f32 0.001953125, %v698_v2 }
 0x51e   :  { %v702_v4 = vsub.f32 %v700_v3, %v701_v32  ;;  %v2076_v3 = vld [vmem:[%s2731_s9 + $0x138] sm:$0xff] }
 0x520   :  { %v703_v5 = vadd.f32 1e-05, %v702_v4  ;;  %v2092_v4 = vld [vmem:[%s2731_s9 + $0x1b8] sm:$0xff] }
 0x521   :  { %1389 = vmatpush.bf16.msrb.mxu1 %v2092_v4 }
 0x522   :  { %2123 = vrsqrt.f32 %v703_v5  ;;  %vm710_vm13 = vweird.f32 %v703_v5 }
 0x525   :  { %1390 = vmatpush.bf16.msrb.mxu1 %v2091_v13 }
 0x528   :  { %v2124_v7 = vpop.eup %2123 }
 0x529   :  { %v705_v8 = vmul.f32 %v2124_v7, %v703_v5  ;;  %vm711_vm12 = vweird.f32 %v2124_v7  ;;  %1391 = vmatpush.bf16.msrb.mxu1 %v2090_v20 }
 0x52a   :  { %vm712_vm14 = vmor %vm710_vm13, %vm711_vm12 }
 0x52b   :  { %v706_v12 = vmul.f32 %v2124_v7, %v705_v8 }
 0x52d   :  { %v707_v18 = vmul.f32 0.5, %v706_v12  ;;  %v2075_v12 = vld [vmem:[%s2731_s9 + $0x130] sm:$0xff]  ;;  %1392 = vmatpush.bf16.msrb.mxu1 %v2089_v24 }
 0x52f   :  { %v708_v21 = vsub.f32 1.5, %v707_v18  ;;  %v2065_v18 = vld [vmem:[%s2731_s9 + $0xe0] sm:$0xff] }
 0x530   :  { %950 = vmatpush.bf16.msrb.mxu3 %v2065_v18 }
 0x531   :  { %v709_v27 = vmul.f32 %v2124_v7, %v708_v21  ;;  %v2048_v21 = vld [vmem:[%s2731_s9 + $0x58] sm:$0xff] }
 0x532   :  { %852 = vmatpush.bf16.msrb.mxu2 %v2048_v21 }
 0x533   :  { %v713_v28 = vsel %vm712_vm14, %v2124_v7, %v709_v27  ;;  %v2072_v27 = vld [vmem:[%s2731_s9 + $0x118] sm:$0xff] }
 0x534   :  { %v714_v33 = vmul.f32 %v713_v28, %v651_v26  ;;  %951 = vmatpush.bf16.msrb.mxu3 %v2064_v22  ;;  %v2063_v26 = vld [vmem:[%s2731_s9 + $0xd0] sm:$0xff]  ;;  %v2088_v28 = vld [vmem:[%s2731_s9 + $0x198] sm:$0xff] }
 0x535   :  { %1393 = vmatpush.bf16.msrb.mxu1 %v2088_v28 }
 0x536   :  { %v715_v59 = vmul.f32 %v714_v33, %v699_v0  ;;  %v718_v62 = vperm.slane %v714_v33, 0  ;;  %853 = vmatpush.bf16.msrb.mxu2 %v2047_v25  ;;  %v2071_v33 = vld [vmem:[%s2731_s9 + $0x110] sm:$0xff] }
 0x538   :  { %v716_v41 = vsub.f32 %v652_v35, %v715_v59  ;;  %v720_v42 = vmul.f32 %v718_v62, %v2460_v16  ;;  %v722_v44 = vmul.f32 %v718_v62, %v2462_v17  ;;  %v723_v45 = vmul.f32 %v718_v62, %v2473_v29  ;;  %952 = vmatpush.bf16.msrb.mxu3 %v2063_v26  ;;  %v2045_v35 = vld [vmem:[%s2731_s9 + $0x40] sm:$0xff]  ;;  %v2044_v59 = vld [vmem:[%s2731_s9 + $0x38] sm:$0xff] }
 0x539   :  { %v721_v46 = vmul.f32 %v718_v62, %v2458_v15  ;;  %1394 = vmatpush.bf16.msrb.mxu1 %v2087_v34  ;;  %v2060_v62 = vld [vmem:[%s2731_s9 + $0xb8] sm:$0xff] }
 0x53a   :  { %v725_v43 = vperm.slane %v716_v41, 0  ;;  %854 = vmatpush.bf16.msrb.mxu2 %v2046_v30  ;;  %v2043_v41 = vld [vmem:[%s2731_s9 + $0x30] sm:$0xff]  ;;  %v2120_v30 = vld [vmem:[%s2732_s10] ss:$0 sm:$0xff] }
 0x53c   :  { %v727_v49 = vadd.f32 %v725_v43, %v720_v42  ;;  %v729_v16 = vadd.f32 %v725_v43, %v722_v44  ;;  %v730_v50 = vadd.f32 %v725_v43, %v723_v45  ;;  %v728_v51 = vadd.f32 %v725_v43, %v721_v46  ;;  %953 = vmatpush.bf16.msrb.mxu3 %v2062_v31  ;;  %v2059_v42 = vld [vmem:[%s2731_s9 + $0xb0] sm:$0xff]  ;;  %v2069_v43 = vld [vmem:[%s2731_s9 + $0x100] sm:$0xff]  ;;  %v2042_v45 = vld [vmem:[%s2731_s9 + $0x28] sm:$0xff] }
 0x53d   :  { %1395 = vmatpush.bf16.msrb.mxu1 %v2086_v10  ;;  %v2085_v44 = vld [vmem:[%s2731_s9 + $0x180] sm:$0xff]  ;;  %v2058_v46 = vld [vmem:[%s2731_s9 + $0xa8] sm:$0xff] }
 0x53e   :  { %v731_v17 = vadd.f32 %v727_v49, %v2413_v37  ;;  %v733_v29 = vadd.f32 %v729_v16, %v2419_v40  ;;  %v734_v15 = vadd.f32 %v730_v50, %v2417_v39  ;;  %v732_v52 = vadd.f32 %v728_v51, %v2415_v38  ;;  %v2077_v38 = vld [vmem:[%s2731_s9 + $0x140] sm:$0xff]  ;;  %855 = vmatpush.bf16.msrb.mxu2 %v2045_v35  ;;  %v2040_v51 = vld [vmem:[%s2731_s9 + $0x18] sm:$0xff] }
 0x53f   :  { %1053 = vmatpush.bf16.msra.mxu0 %v2077_v38 }
 0x540   :  { %v735_v55 = vmax.f32 %v731_v17, 0.0  ;;  %v737_v56 = vmax.f32 %v733_v29, 0.0  ;;  %v738_v57 = vmax.f32 %v734_v15, 0.0  ;;  %v736_v37 = vmax.f32 %v732_v52, 0.0  ;;  %954 = vmatpush.bf16.msrb.mxu3 %v2061_v36  ;;  %v2056_v17 = vld [vmem:[%s2731_s9 + $0x98] sm:$0xff] }
 0x541   :  { %1396 = vmatpush.bf16.msrb.mxu1 %v2085_v44 }
 0x542   :  { %v739_v58 = vrot.slane %v735_v55, 2  ;;  %v741_v40 = vrot.slane %v737_v56, 2  ;;  %v742_v60 = vrot.slane %v738_v57, 2  ;;  %v740_v39 = vrot.slane %v736_v37, 2  ;;  %1206 = vmatpush.bf16.msra.mxu2 %v2044_v59 }
 0x543   :  { %1328 = vmatpush.bf16.msrb.mxu0 %v2076_v3 }
 0x544   :  { %v743_v0 = vsel %vm74_vm1, %v741_v40, %v742_v60  ;;  %v746_v1 = vsel %vm74_vm1, %v742_v60, %v739_v58  ;;  %v744_v2 = vsel %vm74_vm1, %v740_v39, %v741_v40  ;;  %v745_v32 = vsel %vm74_vm1, %v739_v58, %v740_v39  ;;  %1267 = vmatpush.bf16.msra.mxu3 %v2060_v62  ;;  %v2054_v58 = vld [vmem:[%s2731_s9 + $0x88] sm:$0xff]  ;;  %v2037_v40 = vld [vmem:[%s2731_s9] sm:$0xff] }
 0x545   :  { %v2580_v5 = vmax.f32 %v737_v56, %v743_v0  ;;  %v2582_v7 = vmax.f32 %v738_v57, %v746_v1  ;;  %v2584_v8 = vmax.f32 %v735_v55, %v745_v32  ;;  %v2586_v9 = vmax.f32 %v736_v37, %v744_v2  ;;  %v2055_v55 = vld [vmem:[%s2731_s9 + $0x90] sm:$0xff]  ;;  %v2038_v37 = vld [vmem:[%s2731_s9 + $0x8] sm:$0xff]  ;;  %v2053_v60 = vld [vmem:[%s2731_s9 + $0x80] sm:$0xff] }
 0x546   :  { %1207 = vmatpush.bf16.msra.mxu2 %v2043_v41 }
 0x547   :  { %v2113_v6 = vpack.i.bf16 %v2582_v7, %v2580_v5  ;;  %v2108_v11 = vpack.i.bf16 %v2586_v9, %v2584_v8  ;;  %1329 = vmatpush.bf16.msrb.mxu0 %v2075_v12 }
 0x548   :  { %1268 = vmatpush.bf16.msra.mxu3 %v2059_v42 }
 0x549   :  { %2114 = vrot.lane.b32.xlu2 %v2113_v6, %s2156_s7  ;;  %2109 = vrot.lane.b32.xlu1 %v2108_v11, %s2156_s7 }
 0x54a   :  { %1208 = vmatpush.bf16.msra.mxu2 %v2042_v45 }
 0x54b   :  { %1330 = vmatpush.bf16.msrb.mxu0 %v2074_v19 }
 0x54c   :  { %1269 = vmatpush.bf16.msra.mxu3 %v2058_v46 }
 0x54e   :  { %1209 = vmatpush.bf16.msra.mxu2 %v2041_v47 }
 0x54f   :  { %1331 = vmatpush.bf16.msrb.mxu0 %v2073_v23 }
 0x550   :  { %1270 = vmatpush.bf16.msra.mxu3 %v2057_v48 }
 0x552   :  { %1210 = vmatpush.bf16.msra.mxu2 %v2040_v51 }
 0x553   :  { %1332 = vmatpush.bf16.msrb.mxu0 %v2072_v27 }
 0x554   :  { %1271 = vmatpush.bf16.msra.mxu3 %v2056_v17 }
 0x556   :  { %1211 = vmatpush.bf16.msra.mxu2 %v2039_v54 }
 0x557   :  { %1333 = vmatpush.bf16.msrb.mxu0 %v2071_v33 }
 0x558   :  { %1272 = vmatpush.bf16.msra.mxu3 %v2055_v55 }
 0x55a   :  { %1212 = vmatpush.bf16.msra.mxu2 %v2038_v37 }
 0x55b   :  { %1334 = vmatpush.bf16.msrb.mxu0 %v2070_v63 }
 0x55c   :  { %1273 = vmatpush.bf16.msra.mxu3 %v2054_v58 }
 0x55e   :  { %1213 = vmatpush.bf16.msra.mxu2 %v2037_v40 }
 0x55f   :  { %1335 = vmatpush.bf16.msrb.mxu0 %v2069_v43 }
 0x560   :  { %1274 = vmatpush.bf16.msra.mxu3 %v2053_v60 }
 0x5a3   :  { %v2115_v49 = vpop.permute.xlu2 %2114 }
 0x5a4   :  { %v2117_v16 = vunpack.i.h.bf16 %v2115_v49  ;;  %v2116_v50 = vunpack.i.l.bf16 %v2115_v49 }
 0x5a6   :  { %v762_v29 = vmax.f32 %v2582_v7, %v2117_v16  ;;  %v761_v15 = vmax.f32 %v2580_v5, %v2116_v50 }
 0x5a8   :  { %v1076_v52 = vpack.c.bf16 %v762_v29, %v762_v29  ;;  %v977_v53 = vpack.c.bf16 %v761_v15, %v761_v15 }
 0x5aa   :  { %v1095_v56 = vrot.slane %v1076_v52, 2  ;;  %v996_v57 = vrot.slane %v977_v53, 2 }
 0x5ac   :  { %1054 = vmatmul.bf16.vlgmr.msra.gmra.mxu0 %v996_v57  ;;  %1153 = vmatmul.bf16.vlgmr.msra.gmra.mxu1 %v1095_v56 }
 0x5bb   :  { %v2110_v39 = vpop.permute.xlu1 %2109 }
 0x5bc   :  { %v2112_v38 = vunpack.i.h.bf16 %v2110_v39  ;;  %v2111_v61 = vunpack.i.l.bf16 %v2110_v39  ;;  %1336 = vmatmul.bf16.vlgmr.msrb.gmra.mxu0 %v977_v53  ;;  %1397 = vmatmul.bf16.vlgmr.msrb.gmra.mxu1 %v1076_v52 }
 0x5be   :  { %v760_v0 = vmax.f32 %v2586_v9, %v2112_v38  ;;  %v759_v1 = vmax.f32 %v2584_v8, %v2111_v61 }
 0x5c0   :  { %v878_v2 = vpack.c.bf16 %v760_v0, %v760_v0  ;;  %v779_v32 = vpack.c.bf16 %v759_v1, %v759_v1 }
 0x5c2   :  { %v798_v3 = vrot.slane %v779_v32, 2  ;;  %v897_v4 = vrot.slane %v878_v2, 2 }
 0x5c4   :  { %856 = vmatmul.bf16.vlgmr.msrb.gmra.mxu2 %v798_v3  ;;  %955 = vmatmul.bf16.vlgmr.msrb.gmra.mxu3 %v897_v4 }
 0x5d4   :  { %1214 = vmatmul.bf16.vlgmr.msra.gmra.mxu2 %v779_v32  ;;  %1275 = vmatmul.bf16.vlgmr.msra.gmra.mxu3 %v878_v2 }
 0x629   :  { %v1055_v5 = vpop.f32.mrf.mxu0  ;;  %v1154_v7 = vpop.f32.mrf.mxu1 }
 0x631   :  { %v1057_v6 = vpop.f32.mrf.mxu0  ;;  %v1156_v11 = vpop.f32.mrf.mxu1 }
 0x639   :  { %v1337_v12 = vpop.f32.mrf.mxu0  ;;  %v1398_v13 = vpop.f32.mrf.mxu1 }
 0x63a   :  { %v1338_v21 = vadd.f32 %v1337_v12, %v1055_v5  ;;  %v1399_v22 = vadd.f32 %v1398_v13, %v1154_v7 }
 0x63c   :  { %v1403_v27 = vadd.f32 %v1399_v22, %v1338_v21 }
 0x641   :  { %v1339_v14 = vpop.f32.mrf.mxu0  ;;  %v1400_v18 = vpop.f32.mrf.mxu1 }
 0x647   :  { %v857_v19 = vpop.f32.mrf.mxu2  ;;  %v956_v9 = vpop.f32.mrf.mxu3 }
 0x64f   :  { %v859_v20 = vpop.f32.mrf.mxu2  ;;  %v958_v8 = vpop.f32.mrf.mxu3 }
 0x657   :  { %v1215_v23 = vpop.f32.mrf.mxu2  ;;  %v1276_v24 = vpop.f32.mrf.mxu3 }
 0x658   :  { %v1216_v25 = vadd.f32 %v1215_v23, %v857_v19  ;;  %v1277_v26 = vadd.f32 %v1276_v24, %v956_v9 }
 0x65a   :  { %v1402_v28 = vadd.f32 %v1277_v26, %v1216_v25 }
 0x65c   :  { %v1404_v31 = vadd.f32 %v1403_v27, %v1402_v28 }
 0x65e   :  { %v1409_v33 = vadd.f32 %v2120_v30, %v1404_v31 }
 0x65f   :  { %v1217_v34 = vpop.f32.mrf.mxu2  ;;  %v1278_v35 = vpop.f32.mrf.mxu3 }
 0x660   :  { %1410 = vst [vmem:[#allocation2] sm:$0x3] %v1409_v33 }
 0x661   :  { %1421 = dma.vmem_to_hbm [thread:$0]  %s1417_s5, 32, %s1419_s6, [#allocation3]  }
 0x662   :  { %2149 = dma.done.wait [#allocation3], 32  }
 0x663   :  { %2150 = vsyncadd [#allocation3], 4294967264 }
 0x664   :  { %1426 = vsyncpa [#allocation3], 1 }

</bundles_post_ra>
